<compile_context>
chip_gen: v7x
topology: tpu7x:2x2x1
jax: 0.10.0
libtpu: 0.0.40
codegen_flags: <defaults>
</compile_context>

<pallas_src>
from functools import partial

import jax
import jax.numpy as jnp
import numpy as np
from jax.experimental import pallas as pl
from jax.experimental.pallas import tpu as pltpu

HIDDEN = 20      # nn.GRU(hidden_size=20)
LP = 128         # lane padding per gate block (vreg lane width)

# 8-aligned row offsets of the weight blocks inside the packed slab.
_R_W1, _R_U1, _R_W2, _R_U2, _W_ROWS = 0, 16, 40, 56, 80


# ---------------------------------------------------------------------------
# Kernel
# ---------------------------------------------------------------------------
def gru_ae_kernel(x_ref,     # (S*B, D) bf16, time-major rows (t*B + b)
                  w_ref,     # (80, 512) bf16 packed weights
                  b_ref,     # (4, 512)  f32 packed biases
                  out_ref,   # (S*B, D)  f32, time-major, already flipped
                  *, S, B, H):
    D = out_ref.shape[1]
    f32 = jnp.float32
    bf16 = jnp.bfloat16

    # ---- packed weight views (static, 8-aligned row offsets) --------------
    w1x = w_ref[_R_W1:_R_W1 + D, 0:3 * LP]      # encoder input  [w1r|w1z|w1n]
    u1h = w_ref[_R_U1:_R_U1 + H, 0:3 * LP]      # encoder hidden [u1r|u1z|u1n]
    w2x = w_ref[_R_W2:_R_W2 + D, 0:3 * LP]      # decoder input  [w2r|w2z|w2n]
    u2hf = w_ref[_R_U2:_R_U2 + H, :]            # decoder hidden [u2r|u2z|u2n|wfc]

    # ---- biases (f32), broadcasts hoisted out of the step loops -----------
    b1x = b_ref[0:1, 0:3 * LP]                                   # folded r/z + n_in
    b1hn = jnp.broadcast_to(b_ref[1:2, 2 * LP:2 * LP + H], (B, H))
    b2x = jnp.broadcast_to(b_ref[2:3, 0:3 * LP], (B, 3 * LP))
    b2hf = jnp.broadcast_to(b_ref[3:4, :], (B, 4 * LP))          # [0|0|b2hn|bfc]

    # ---- encoder input projection hoisted out of the recurrence -----------
    gi_all = jnp.dot(x_ref[...], w1x, preferred_element_type=f32) + b1x   # (S*B, 384)

    # ---- encoder recurrence: h carried in vregs, fully unrolled ------------
    h = jnp.zeros((B, H), f32)
    for t in range(S):                                   # S static -> unrolled
        gi = gi_all[t * B:(t + 1) * B, :]                # (B, 384)
        gh = jnp.dot(h.astype(bf16), u1h, preferred_element_type=f32)
        rz = jax.nn.sigmoid(gi[:, :2 * LP] + gh[:, :2 * LP])     # one packed EUP push
        r = rz[:, :H]
        z = rz[:, LP:LP + H]
        n = jnp.tanh(gi[:, 2 * LP:2 * LP + H] + r * (gh[:, 2 * LP:2 * LP + H] + b1hn))
        h = (1.0 - z) * n + z * h
    h = jnp.tanh(h)                                      # h = tanh(gru1(x)[1])

    # ---- decoder: one packed dot on h gives gate pre-acts AND fc ----------
    ghf = jnp.dot(h.astype(bf16), u2hf, preferred_element_type=f32) + b2hf   # (B, 512)
    x_dec = jnp.tanh(ghf[:, 3 * LP:3 * LP + D])          # x = tanh(fc(h))
    steps = [x_dec]
    for _ in range(S - 1):
        gx = jnp.dot(x_dec.astype(bf16), w2x, preferred_element_type=f32) + b2x
        rz = jax.nn.sigmoid(gx[:, :2 * LP] + ghf[:, :2 * LP])
        r = rz[:, :H]
        z = rz[:, LP:LP + H]
        n = jnp.tanh(gx[:, 2 * LP:2 * LP + H] + r * ghf[:, 2 * LP:2 * LP + H])
        h = jnp.tanh((1.0 - z) * n + z * h)              # h = tanh(gru2(x, h)[1])
        ghf = jnp.dot(h.astype(bf16), u2hf, preferred_element_type=f32) + b2hf
        x_dec = jnp.tanh(ghf[:, 3 * LP:3 * LP + D])      # x = tanh(fc(h))
        steps.append(x_dec)

    # xs.flip(1): decoded step k -> seq index S-1-k.  Single dense store.
    out_ref[...] = jnp.concatenate(steps[::-1], axis=0)


# ---------------------------------------------------------------------------
# Host-side parameter packing (done ONCE, outside the per-call path).
# ---------------------------------------------------------------------------
def _split_gates(w, H=HIDDEN):
    """(in, 3H) packed [r|z|n] -> three (in, H)."""
    return w[:, :H], w[:, H:2 * H], w[:, 2 * H:]


def prepare_kernel_params(params, H=HIDDEN):
    assert H <= LP
    D = params["w1ih"].shape[0]
    assert D <= LP

    w1r, w1z, w1n = _split_gates(params["w1ih"])
    u1r, u1z, u1n = _split_gates(params["w1hh"])
    b1ir, b1iz, b1in = _split_gates(params["b1ih"])
    b1hr, b1hz, b1hn = _split_gates(params["b1hh"])
    w2r, w2z, w2n = _split_gates(params["w2ih"])
    u2r, u2z, u2n = _split_gates(params["w2hh"])
    b2ir, b2iz, b2in = _split_gates(params["b2ih"])
    b2hr, b2hz, b2hn = _split_gates(params["b2hh"])
    wfc, bfc = params["wfc"], params["bfc"]

    def put(slab, r0, blk, mat):
        rr, cc = mat.shape
        return slab.at[r0:r0 + rr, blk * LP:blk * LP + cc].set(mat)

    wslab = jnp.zeros((_W_ROWS, 4 * LP), jnp.float32)
    for blk, m in enumerate((w1r, w1z, w1n)):
        wslab = put(wslab, _R_W1, blk, m)
    for blk, m in enumerate((u1r, u1z, u1n)):
        wslab = put(wslab, _R_U1, blk, m)
    for blk, m in enumerate((w2r, w2z, w2n)):
        wslab = put(wslab, _R_W2, blk, m)
    for blk, m in enumerate((u2r, u2z, u2n, wfc)):
        wslab = put(wslab, _R_U2, blk, m)
    wslab = wslab.astype(jnp.bfloat16)                   # bf16 MXU operands

    bslab = jnp.zeros((4, 4 * LP), jnp.float32)
    bslab = put(bslab, 0, 0, b1ir + b1hr)                # encoder r bias (folded)
    bslab = put(bslab, 0, 1, b1iz + b1hz)                # encoder z bias (folded)
    bslab = put(bslab, 0, 2, b1in)                       # encoder n input-side bias
    bslab = put(bslab, 1, 2, b1hn)                       # encoder n hidden-side bias
    bslab = put(bslab, 2, 0, b2ir + b2hr)
    bslab = put(bslab, 2, 1, b2iz + b2hz)
    bslab = put(bslab, 2, 2, b2in)
    bslab = put(bslab, 3, 2, b2hn)
    bslab = put(bslab, 3, 3, bfc)
    return wslab, bslab


# ---------------------------------------------------------------------------
# Forward wrapper (single jit: one-hot / concat / transpose fuse).
# ---------------------------------------------------------------------------
@partial(jax.jit, static_argnames=("onehot_sizes",))
def gru_ae_forward(x, onehot_idx, wslab, bslab, onehot_sizes):
    """x: (B, S, input_record_width) f32, onehot_idx: (B, S, n_onehots) int32."""
    embs = [jax.nn.one_hot(onehot_idx[..., i], n, dtype=x.dtype)
            for i, n in enumerate(onehot_sizes)]
    x_cat = jnp.concatenate([x] + embs, axis=-1)          # (B, S, D)
    origin = x_cat
    B, S, D = x_cat.shape

    # Time-major flattened rows (t*B + b) so the encoder input projection is
    # one batched matmul inside the kernel; cast to bf16 for the MXU.
    x_tm = jnp.transpose(x_cat, (1, 0, 2)).reshape(S * B, D).astype(jnp.bfloat16)

    vmem = pl.BlockSpec(memory_space=pltpu.MemorySpace.VMEM)
    xs_flip_tm = pl.pallas_call(
        partial(gru_ae_kernel, S=S, B=B, H=HIDDEN),
        out_shape=jax.ShapeDtypeStruct((S * B, D), jnp.float32),
        in_specs=[vmem, vmem, vmem],
        out_specs=vmem,
    )(x_tm, wslab, bslab)

    xs = jnp.transpose(xs_flip_tm.reshape(S, B, D), (1, 0, 2))   # (B, S, D)
    return origin, xs


# ---------------------------------------------------------------------------
# Pure-JAX f32 reference (packed PyTorch-style params; validates packing too)
# ---------------------------------------------------------------------------
def reference_forward(x_cat, params):
    B, S, D = x_cat.shape
    H = HIDDEN

    def cell(x_t, h, wih, whh, bih, bhh):
        gi = x_t @ wih + bih
        gh = h @ whh + bhh
        r = jax.nn.sigmoid(gi[:, :H] + gh[:, :H])
        z = jax.nn.sigmoid(gi[:, H:2 * H] + gh[:, H:2 * H])
        n = jnp.tanh(gi[:, 2 * H:] + r * gh[:, 2 * H:])
        return (1.0 - z) * n + z * h

    h = jnp.zeros((B, H), jnp.float32)
    for t in range(S):
        h = cell(x_cat[:, t], h, params["w1ih"], params["w1hh"],
                 params["b1ih"], params["b1hh"])
    h = jnp.tanh(h)
    x = jnp.tanh(h @ params["wfc"] + params["bfc"])
    xs = [x]
    for _ in range(S - 1):
        h = jnp.tanh(cell(x, h, params["w2ih"], params["w2hh"],
                          params["b2ih"], params["b2hh"]))
        x = jnp.tanh(h @ params["wfc"] + params["bfc"])
        xs.append(x)
    xs = jnp.stack(xs, 1)
    return x_cat, xs[:, ::-1, :]


# ---------------------------------------------------------------------------
def init_params(key, D, H=HIDDEN):
    ks = jax.random.split(key, 11)
    s = 1.0 / np.sqrt(H)

    def u(k, shape):
        return jax.random.uniform(k, shape, jnp.float32, -s, s)

    return {
        "w1ih": u(ks[0], (D, 3 * H)), "w1hh": u(ks[1], (H, 3 * H)),
        "b1ih": u(ks[2], (1, 3 * H)), "b1hh": u(ks[3], (1, 3 * H)),
        "w2ih": u(ks[4], (D, 3 * H)), "w2hh": u(ks[5], (H, 3 * H)),
        "b2ih": u(ks[6], (1, 3 * H)), "b2hh": u(ks[7], (1, 3 * H)),
        "wfc":  u(ks[8], (H, D)),     "bfc":  u(ks[9], (1, D)),
    }


if __name__ == "__main__":
    key = jax.random.PRNGKey(0)
    k_x, k_o, k_p = jax.random.split(key, 3)

    B, S = 2, 8
    input_record_width = 6
    onehot_sizes = (3, 4)                       # embedding output_dim = 7
    D = input_record_width + sum(onehot_sizes)  # 13

    x = jax.random.normal(k_x, (B, S, input_record_width), jnp.float32)
    onehot_idx = jnp.stack(
        [jax.random.randint(jax.random.fold_in(k_o, i), (B, S), 0, n)
         for i, n in enumerate(onehot_sizes)], axis=-1).astype(jnp.int32)

    params = init_params(k_p, D)
    # Param packing done once, outside the per-call path (cache for serving).
    wslab, bslab = prepare_kernel_params(params)

    origin, xs = gru_ae_forward(x, onehot_idx, wslab, bslab, onehot_sizes)
    jax.block_until_ready((origin, xs))

    # Correctness check against plain-JAX f32 reference.  Kernel matmuls use
    # bf16 operands (f32 accumulation), so tolerances are loosened.
    origin_ref, xs_ref = reference_forward(origin, params)
    np.testing.assert_allclose(np.asarray(origin), np.asarray(origin_ref),
                               rtol=1e-5, atol=1e-5)
    np.testing.assert_allclose(np.asarray(xs), np.asarray(xs_ref),
                               rtol=5e-2, atol=5e-2)

    print("KERNEL_OK")
</pallas_src>

<mosaic_0001>
module attributes {stable_mosaic.version = 11 : i64} {
  func.func @gru_ae_kernel(%arg0: memref<16x13xbf16, #tpu.memory_space<vmem>>, %arg1: memref<80x512xbf16, #tpu.memory_space<vmem>>, %arg2: memref<4x512xf32, #tpu.memory_space<vmem>>, %arg3: memref<16x13xf32, #tpu.memory_space<vmem>>) attributes {dimension_semantics = [], scalar_prefetch = 0 : i64, scratch_operands = 0 : i64, tpu.core_type = #tpu.core_type<tc>} {
    %c0 = arith.constant 0 : index
    %c0_0 = arith.constant 0 : index
    %0 = vector.load %arg1[%c0, %c0_0] : memref<80x512xbf16, #tpu.memory_space<vmem>>, vector<13x384xbf16>
    %c16 = arith.constant 16 : index
    %c0_1 = arith.constant 0 : index
    %1 = vector.load %arg1[%c16, %c0_1] : memref<80x512xbf16, #tpu.memory_space<vmem>>, vector<20x384xbf16>
    %c40 = arith.constant 40 : index
    %c0_2 = arith.constant 0 : index
    %2 = vector.load %arg1[%c40, %c0_2] : memref<80x512xbf16, #tpu.memory_space<vmem>>, vector<13x384xbf16>
    %c56 = arith.constant 56 : index
    %c0_3 = arith.constant 0 : index
    %3 = vector.load %arg1[%c56, %c0_3] : memref<80x512xbf16, #tpu.memory_space<vmem>>, vector<20x512xbf16>
    %c0_4 = arith.constant 0 : index
    %c0_5 = arith.constant 0 : index
    %4 = vector.load %arg2[%c0_4, %c0_5] : memref<4x512xf32, #tpu.memory_space<vmem>>, vector<1x384xf32>
    %c1 = arith.constant 1 : index
    %c256 = arith.constant 256 : index
    %5 = vector.load %arg2[%c1, %c256] : memref<4x512xf32, #tpu.memory_space<vmem>>, vector<1x20xf32>
    %6 = vector.shape_cast %5 : vector<1x20xf32> to vector<1x20xf32>
    %7 = vector.broadcast %6 : vector<1x20xf32> to vector<2x20xf32>
    %c2 = arith.constant 2 : index
    %c0_6 = arith.constant 0 : index
    %8 = vector.load %arg2[%c2, %c0_6] : memref<4x512xf32, #tpu.memory_space<vmem>>, vector<1x384xf32>
    %9 = vector.shape_cast %8 : vector<1x384xf32> to vector<1x384xf32>
    %10 = vector.broadcast %9 : vector<1x384xf32> to vector<2x384xf32>
    %c3 = arith.constant 3 : index
    %c0_7 = arith.constant 0 : index
    %11 = vector.load %arg2[%c3, %c0_7] : memref<4x512xf32, #tpu.memory_space<vmem>>, vector<1x512xf32>
    %12 = vector.shape_cast %11 : vector<1x512xf32> to vector<1x512xf32>
    %13 = vector.broadcast %12 : vector<1x512xf32> to vector<2x512xf32>
    %c0_8 = arith.constant 0 : index
    %c0_9 = arith.constant 0 : index
    %14 = vector.load %arg0[%c0_8, %c0_9] : memref<16x13xbf16, #tpu.memory_space<vmem>>, vector<16x13xbf16>
    %cst = arith.constant dense<0.000000e+00> : vector<16x384xf32>
    %15 = tpu.matmul %14, %0, %cst {dimension_numbers = #tpu.dot_dimension_numbers<[1], [0], [0], [1], [0, 0, 1, 1], [], []>} : vector<16x13xbf16>, vector<13x384xbf16>, vector<16x384xf32> -> vector<16x384xf32>
    %16 = vector.broadcast %4 : vector<1x384xf32> to vector<16x384xf32>
    %17 = arith.addf %15, %16 : vector<16x384xf32>
    %cst_10 = arith.constant 0.000000e+00 : f32
    %18 = vector.broadcast %cst_10 : f32 to vector<2x20xf32>
    %19 = vector.extract_strided_slice %17 {offsets = [0, 0], sizes = [2, 384], strides = [1, 1]} : vector<16x384xf32> to vector<2x384xf32>
    %20 = arith.truncf %18 : vector<2x20xf32> to vector<2x20xbf16>
    %cst_11 = arith.constant dense<0.000000e+00> : vector<2x384xf32>
    %21 = tpu.matmul %20, %1, %cst_11 {dimension_numbers = #tpu.dot_dimension_numbers<[1], [0], [0], [1], [0, 0, 1, 1], [], []>} : vector<2x20xbf16>, vector<20x384xbf16>, vector<2x384xf32> -> vector<2x384xf32>
    %22 = vector.extract_strided_slice %19 {offsets = [0, 0], sizes = [2, 256], strides = [1, 1]} : vector<2x384xf32> to vector<2x256xf32>
    %23 = vector.extract_strided_slice %21 {offsets = [0, 0], sizes = [2, 256], strides = [1, 1]} : vector<2x384xf32> to vector<2x256xf32>
    %24 = arith.addf %22, %23 : vector<2x256xf32>
    %25 = arith.negf %24 : vector<2x256xf32>
    %26 = math.exp %25 : vector<2x256xf32>
    %cst_12 = arith.constant 1.000000e+00 : f32
    %27 = vector.broadcast %cst_12 : f32 to vector<2x256xf32>
    %28 = arith.addf %27, %26 : vector<2x256xf32>
    %29 = arith.divf %27, %28 : vector<2x256xf32>
    %30 = vector.extract_strided_slice %29 {offsets = [0, 0], sizes = [2, 20], strides = [1, 1]} : vector<2x256xf32> to vector<2x20xf32>
    %31 = vector.extract_strided_slice %29 {offsets = [0, 128], sizes = [2, 20], strides = [1, 1]} : vector<2x256xf32> to vector<2x20xf32>
    %32 = vector.extract_strided_slice %19 {offsets = [0, 256], sizes = [2, 20], strides = [1, 1]} : vector<2x384xf32> to vector<2x20xf32>
    %33 = vector.extract_strided_slice %21 {offsets = [0, 256], sizes = [2, 20], strides = [1, 1]} : vector<2x384xf32> to vector<2x20xf32>
    %34 = arith.addf %33, %7 : vector<2x20xf32>
    %35 = arith.mulf %30, %34 : vector<2x20xf32>
    %36 = arith.addf %32, %35 : vector<2x20xf32>
    %37 = math.tanh %36 : vector<2x20xf32>
    %cst_13 = arith.constant 1.000000e+00 : f32
    %38 = vector.broadcast %cst_13 : f32 to vector<2x20xf32>
    %39 = arith.subf %38, %31 : vector<2x20xf32>
    %40 = arith.mulf %39, %37 : vector<2x20xf32>
    %41 = arith.mulf %31, %18 : vector<2x20xf32>
    %42 = arith.addf %40, %41 : vector<2x20xf32>
    %43 = vector.extract_strided_slice %17 {offsets = [2, 0], sizes = [2, 384], strides = [1, 1]} : vector<16x384xf32> to vector<2x384xf32>
    %44 = arith.truncf %42 : vector<2x20xf32> to vector<2x20xbf16>
    %cst_14 = arith.constant dense<0.000000e+00> : vector<2x384xf32>
    %45 = tpu.matmul %44, %1, %cst_14 {dimension_numbers = #tpu.dot_dimension_numbers<[1], [0], [0], [1], [0, 0, 1, 1], [], []>} : vector<2x20xbf16>, vector<20x384xbf16>, vector<2x384xf32> -> vector<2x384xf32>
    %46 = vector.extract_strided_slice %43 {offsets = [0, 0], sizes = [2, 256], strides = [1, 1]} : vector<2x384xf32> to vector<2x256xf32>
    %47 = vector.extract_strided_slice %45 {offsets = [0, 0], sizes = [2, 256], strides = [1, 1]} : vector<2x384xf32> to vector<2x256xf32>
    %48 = arith.addf %46, %47 : vector<2x256xf32>
    %49 = arith.negf %48 : vector<2x256xf32>
    %50 = math.exp %49 : vector<2x256xf32>
    %cst_15 = arith.constant 1.000000e+00 : f32
    %51 = vector.broadcast %cst_15 : f32 to vector<2x256xf32>
    %52 = arith.addf %51, %50 : vector<2x256xf32>
    %53 = arith.divf %51, %52 : vector<2x256xf32>
    %54 = vector.extract_strided_slice %53 {offsets = [0, 0], sizes = [2, 20], strides = [1, 1]} : vector<2x256xf32> to vector<2x20xf32>
    %55 = vector.extract_strided_slice %53 {offsets = [0, 128], sizes = [2, 20], strides = [1, 1]} : vector<2x256xf32> to vector<2x20xf32>
    %56 = vector.extract_strided_slice %43 {offsets = [0, 256], sizes = [2, 20], strides = [1, 1]} : vector<2x384xf32> to vector<2x20xf32>
    %57 = vector.extract_strided_slice %45 {offsets = [0, 256], sizes = [2, 20], strides = [1, 1]} : vector<2x384xf32> to vector<2x20xf32>
    %58 = arith.addf %57, %7 : vector<2x20xf32>
    %59 = arith.mulf %54, %58 : vector<2x20xf32>
    %60 = arith.addf %56, %59 : vector<2x20xf32>
    %61 = math.tanh %60 : vector<2x20xf32>
    %cst_16 = arith.constant 1.000000e+00 : f32
    %62 = vector.broadcast %cst_16 : f32 to vector<2x20xf32>
    %63 = arith.subf %62, %55 : vector<2x20xf32>
    %64 = arith.mulf %63, %61 : vector<2x20xf32>
    %65 = arith.mulf %55, %42 : vector<2x20xf32>
    %66 = arith.addf %64, %65 : vector<2x20xf32>
    %67 = vector.extract_strided_slice %17 {offsets = [4, 0], sizes = [2, 384], strides = [1, 1]} : vector<16x384xf32> to vector<2x384xf32>
    %68 = arith.truncf %66 : vector<2x20xf32> to vector<2x20xbf16>
    %cst_17 = arith.constant dense<0.000000e+00> : vector<2x384xf32>
    %69 = tpu.matmul %68, %1, %cst_17 {dimension_numbers = #tpu.dot_dimension_numbers<[1], [0], [0], [1], [0, 0, 1, 1], [], []>} : vector<2x20xbf16>, vector<20x384xbf16>, vector<2x384xf32> -> vector<2x384xf32>
    %70 = vector.extract_strided_slice %67 {offsets = [0, 0], sizes = [2, 256], strides = [1, 1]} : vector<2x384xf32> to vector<2x256xf32>
    %71 = vector.extract_strided_slice %69 {offsets = [0, 0], sizes = [2, 256], strides = [1, 1]} : vector<2x384xf32> to vector<2x256xf32>
    %72 = arith.addf %70, %71 : vector<2x256xf32>
    %73 = arith.negf %72 : vector<2x256xf32>
    %74 = math.exp %73 : vector<2x256xf32>
    %cst_18 = arith.constant 1.000000e+00 : f32
    %75 = vector.broadcast %cst_18 : f32 to vector<2x256xf32>
    %76 = arith.addf %75, %74 : vector<2x256xf32>
    %77 = arith.divf %75, %76 : vector<2x256xf32>
    %78 = vector.extract_strided_slice %77 {offsets = [0, 0], sizes = [2, 20], strides = [1, 1]} : vector<2x256xf32> to vector<2x20xf32>
    %79 = vector.extract_strided_slice %77 {offsets = [0, 128], sizes = [2, 20], strides = [1, 1]} : vector<2x256xf32> to vector<2x20xf32>
    %80 = vector.extract_strided_slice %67 {offsets = [0, 256], sizes = [2, 20], strides = [1, 1]} : vector<2x384xf32> to vector<2x20xf32>
    %81 = vector.extract_strided_slice %69 {offsets = [0, 256], sizes = [2, 20], strides = [1, 1]} : vector<2x384xf32> to vector<2x20xf32>
    %82 = arith.addf %81, %7 : vector<2x20xf32>
    %83 = arith.mulf %78, %82 : vector<2x20xf32>
    %84 = arith.addf %80, %83 : vector<2x20xf32>
    %85 = math.tanh %84 : vector<2x20xf32>
    %cst_19 = arith.constant 1.000000e+00 : f32
    %86 = vector.broadcast %cst_19 : f32 to vector<2x20xf32>
    %87 = arith.subf %86, %79 : vector<2x20xf32>
    %88 = arith.mulf %87, %85 : vector<2x20xf32>
    %89 = arith.mulf %79, %66 : vector<2x20xf32>
    %90 = arith.addf %88, %89 : vector<2x20xf32>
    %91 = vector.extract_strided_slice %17 {offsets = [6, 0], sizes = [2, 384], strides = [1, 1]} : vector<16x384xf32> to vector<2x384xf32>
    %92 = arith.truncf %90 : vector<2x20xf32> to vector<2x20xbf16>
    %cst_20 = arith.constant dense<0.000000e+00> : vector<2x384xf32>
    %93 = tpu.matmul %92, %1, %cst_20 {dimension_numbers = #tpu.dot_dimension_numbers<[1], [0], [0], [1], [0, 0, 1, 1], [], []>} : vector<2x20xbf16>, vector<20x384xbf16>, vector<2x384xf32> -> vector<2x384xf32>
    %94 = vector.extract_strided_slice %91 {offsets = [0, 0], sizes = [2, 256], strides = [1, 1]} : vector<2x384xf32> to vector<2x256xf32>
    %95 = vector.extract_strided_slice %93 {offsets = [0, 0], sizes = [2, 256], strides = [1, 1]} : vector<2x384xf32> to vector<2x256xf32>
    %96 = arith.addf %94, %95 : vector<2x256xf32>
    %97 = arith.negf %96 : vector<2x256xf32>
    %98 = math.exp %97 : vector<2x256xf32>
    %cst_21 = arith.constant 1.000000e+00 : f32
    %99 = vector.broadcast %cst_21 : f32 to vector<2x256xf32>
    %100 = arith.addf %99, %98 : vector<2x256xf32>
    %101 = arith.divf %99, %100 : vector<2x256xf32>
    %102 = vector.extract_strided_slice %101 {offsets = [0, 0], sizes = [2, 20], strides = [1, 1]} : vector<2x256xf32> to vector<2x20xf32>
    %103 = vector.extract_strided_slice %101 {offsets = [0, 128], sizes = [2, 20], strides = [1, 1]} : vector<2x256xf32> to vector<2x20xf32>
    %104 = vector.extract_strided_slice %91 {offsets = [0, 256], sizes = [2, 20], strides = [1, 1]} : vector<2x384xf32> to vector<2x20xf32>
    %105 = vector.extract_strided_slice %93 {offsets = [0, 256], sizes = [2, 20], strides = [1, 1]} : vector<2x384xf32> to vector<2x20xf32>
    %106 = arith.addf %105, %7 : vector<2x20xf32>
    %107 = arith.mulf %102, %106 : vector<2x20xf32>
    %108 = arith.addf %104, %107 : vector<2x20xf32>
    %109 = math.tanh %108 : vector<2x20xf32>
    %cst_22 = arith.constant 1.000000e+00 : f32
    %110 = vector.broadcast %cst_22 : f32 to vector<2x20xf32>
    %111 = arith.subf %110, %103 : vector<2x20xf32>
    %112 = arith.mulf %111, %109 : vector<2x20xf32>
    %113 = arith.mulf %103, %90 : vector<2x20xf32>
    %114 = arith.addf %112, %113 : vector<2x20xf32>
    %115 = vector.extract_strided_slice %17 {offsets = [8, 0], sizes = [2, 384], strides = [1, 1]} : vector<16x384xf32> to vector<2x384xf32>
    %116 = arith.truncf %114 : vector<2x20xf32> to vector<2x20xbf16>
    %cst_23 = arith.constant dense<0.000000e+00> : vector<2x384xf32>
    %117 = tpu.matmul %116, %1, %cst_23 {dimension_numbers = #tpu.dot_dimension_numbers<[1], [0], [0], [1], [0, 0, 1, 1], [], []>} : vector<2x20xbf16>, vector<20x384xbf16>, vector<2x384xf32> -> vector<2x384xf32>
    %118 = vector.extract_strided_slice %115 {offsets = [0, 0], sizes = [2, 256], strides = [1, 1]} : vector<2x384xf32> to vector<2x256xf32>
    %119 = vector.extract_strided_slice %117 {offsets = [0, 0], sizes = [2, 256], strides = [1, 1]} : vector<2x384xf32> to vector<2x256xf32>
    %120 = arith.addf %118, %119 : vector<2x256xf32>
    %121 = arith.negf %120 : vector<2x256xf32>
    %122 = math.exp %121 : vector<2x256xf32>
    %cst_24 = arith.constant 1.000000e+00 : f32
    %123 = vector.broadcast %cst_24 : f32 to vector<2x256xf32>
    %124 = arith.addf %123, %122 : vector<2x256xf32>
    %125 = arith.divf %123, %124 : vector<2x256xf32>
    %126 = vector.extract_strided_slice %125 {offsets = [0, 0], sizes = [2, 20], strides = [1, 1]} : vector<2x256xf32> to vector<2x20xf32>
    %127 = vector.extract_strided_slice %125 {offsets = [0, 128], sizes = [2, 20], strides = [1, 1]} : vector<2x256xf32> to vector<2x20xf32>
    %128 = vector.extract_strided_slice %115 {offsets = [0, 256], sizes = [2, 20], strides = [1, 1]} : vector<2x384xf32> to vector<2x20xf32>
    %129 = vector.extract_strided_slice %117 {offsets = [0, 256], sizes = [2, 20], strides = [1, 1]} : vector<2x384xf32> to vector<2x20xf32>
    %130 = arith.addf %129, %7 : vector<2x20xf32>
    %131 = arith.mulf %126, %130 : vector<2x20xf32>
    %132 = arith.addf %128, %131 : vector<2x20xf32>
    %133 = math.tanh %132 : vector<2x20xf32>
    %cst_25 = arith.constant 1.000000e+00 : f32
    %134 = vector.broadcast %cst_25 : f32 to vector<2x20xf32>
    %135 = arith.subf %134, %127 : vector<2x20xf32>
    %136 = arith.mulf %135, %133 : vector<2x20xf32>
    %137 = arith.mulf %127, %114 : vector<2x20xf32>
    %138 = arith.addf %136, %137 : vector<2x20xf32>
    %139 = vector.extract_strided_slice %17 {offsets = [10, 0], sizes = [2, 384], strides = [1, 1]} : vector<16x384xf32> to vector<2x384xf32>
    %140 = arith.truncf %138 : vector<2x20xf32> to vector<2x20xbf16>
    %cst_26 = arith.constant dense<0.000000e+00> : vector<2x384xf32>
    %141 = tpu.matmul %140, %1, %cst_26 {dimension_numbers = #tpu.dot_dimension_numbers<[1], [0], [0], [1], [0, 0, 1, 1], [], []>} : vector<2x20xbf16>, vector<20x384xbf16>, vector<2x384xf32> -> vector<2x384xf32>
    %142 = vector.extract_strided_slice %139 {offsets = [0, 0], sizes = [2, 256], strides = [1, 1]} : vector<2x384xf32> to vector<2x256xf32>
    %143 = vector.extract_strided_slice %141 {offsets = [0, 0], sizes = [2, 256], strides = [1, 1]} : vector<2x384xf32> to vector<2x256xf32>
    %144 = arith.addf %142, %143 : vector<2x256xf32>
    %145 = arith.negf %144 : vector<2x256xf32>
    %146 = math.exp %145 : vector<2x256xf32>
    %cst_27 = arith.constant 1.000000e+00 : f32
    %147 = vector.broadcast %cst_27 : f32 to vector<2x256xf32>
    %148 = arith.addf %147, %146 : vector<2x256xf32>
    %149 = arith.divf %147, %148 : vector<2x256xf32>
    %150 = vector.extract_strided_slice %149 {offsets = [0, 0], sizes = [2, 20], strides = [1, 1]} : vector<2x256xf32> to vector<2x20xf32>
    %151 = vector.extract_strided_slice %149 {offsets = [0, 128], sizes = [2, 20], strides = [1, 1]} : vector<2x256xf32> to vector<2x20xf32>
    %152 = vector.extract_strided_slice %139 {offsets = [0, 256], sizes = [2, 20], strides = [1, 1]} : vector<2x384xf32> to vector<2x20xf32>
    %153 = vector.extract_strided_slice %141 {offsets = [0, 256], sizes = [2, 20], strides = [1, 1]} : vector<2x384xf32> to vector<2x20xf32>
    %154 = arith.addf %153, %7 : vector<2x20xf32>
    %155 = arith.mulf %150, %154 : vector<2x20xf32>
    %156 = arith.addf %152, %155 : vector<2x20xf32>
    %157 = math.tanh %156 : vector<2x20xf32>
    %cst_28 = arith.constant 1.000000e+00 : f32
    %158 = vector.broadcast %cst_28 : f32 to vector<2x20xf32>
    %159 = arith.subf %158, %151 : vector<2x20xf32>
    %160 = arith.mulf %159, %157 : vector<2x20xf32>
    %161 = arith.mulf %151, %138 : vector<2x20xf32>
    %162 = arith.addf %160, %161 : vector<2x20xf32>
    %163 = vector.extract_strided_slice %17 {offsets = [12, 0], sizes = [2, 384], strides = [1, 1]} : vector<16x384xf32> to vector<2x384xf32>
    %164 = arith.truncf %162 : vector<2x20xf32> to vector<2x20xbf16>
    %cst_29 = arith.constant dense<0.000000e+00> : vector<2x384xf32>
    %165 = tpu.matmul %164, %1, %cst_29 {dimension_numbers = #tpu.dot_dimension_numbers<[1], [0], [0], [1], [0, 0, 1, 1], [], []>} : vector<2x20xbf16>, vector<20x384xbf16>, vector<2x384xf32> -> vector<2x384xf32>
    %166 = vector.extract_strided_slice %163 {offsets = [0, 0], sizes = [2, 256], strides = [1, 1]} : vector<2x384xf32> to vector<2x256xf32>
    %167 = vector.extract_strided_slice %165 {offsets = [0, 0], sizes = [2, 256], strides = [1, 1]} : vector<2x384xf32> to vector<2x256xf32>
    %168 = arith.addf %166, %167 : vector<2x256xf32>
    %169 = arith.negf %168 : vector<2x256xf32>
    %170 = math.exp %169 : vector<2x256xf32>
    %cst_30 = arith.constant 1.000000e+00 : f32
    %171 = vector.broadcast %cst_30 : f32 to vector<2x256xf32>
    %172 = arith.addf %171, %170 : vector<2x256xf32>
    %173 = arith.divf %171, %172 : vector<2x256xf32>
    %174 = vector.extract_strided_slice %173 {offsets = [0, 0], sizes = [2, 20], strides = [1, 1]} : vector<2x256xf32> to vector<2x20xf32>
    %175 = vector.extract_strided_slice %173 {offsets = [0, 128], sizes = [2, 20], strides = [1, 1]} : vector<2x256xf32> to vector<2x20xf32>
    %176 = vector.extract_strided_slice %163 {offsets = [0, 256], sizes = [2, 20], strides = [1, 1]} : vector<2x384xf32> to vector<2x20xf32>
    %177 = vector.extract_strided_slice %165 {offsets = [0, 256], sizes = [2, 20], strides = [1, 1]} : vector<2x384xf32> to vector<2x20xf32>
    %178 = arith.addf %177, %7 : vector<2x20xf32>
    %179 = arith.mulf %174, %178 : vector<2x20xf32>
    %180 = arith.addf %176, %179 : vector<2x20xf32>
    %181 = math.tanh %180 : vector<2x20xf32>
    %cst_31 = arith.constant 1.000000e+00 : f32
    %182 = vector.broadcast %cst_31 : f32 to vector<2x20xf32>
    %183 = arith.subf %182, %175 : vector<2x20xf32>
    %184 = arith.mulf %183, %181 : vector<2x20xf32>
    %185 = arith.mulf %175, %162 : vector<2x20xf32>
    %186 = arith.addf %184, %185 : vector<2x20xf32>
    %187 = vector.extract_strided_slice %17 {offsets = [14, 0], sizes = [2, 384], strides = [1, 1]} : vector<16x384xf32> to vector<2x384xf32>
    %188 = arith.truncf %186 : vector<2x20xf32> to vector<2x20xbf16>
    %cst_32 = arith.constant dense<0.000000e+00> : vector<2x384xf32>
    %189 = tpu.matmul %188, %1, %cst_32 {dimension_numbers = #tpu.dot_dimension_numbers<[1], [0], [0], [1], [0, 0, 1, 1], [], []>} : vector<2x20xbf16>, vector<20x384xbf16>, vector<2x384xf32> -> vector<2x384xf32>
    %190 = vector.extract_strided_slice %187 {offsets = [0, 0], sizes = [2, 256], strides = [1, 1]} : vector<2x384xf32> to vector<2x256xf32>
    %191 = vector.extract_strided_slice %189 {offsets = [0, 0], sizes = [2, 256], strides = [1, 1]} : vector<2x384xf32> to vector<2x256xf32>
    %192 = arith.addf %190, %191 : vector<2x256xf32>
    %193 = arith.negf %192 : vector<2x256xf32>
    %194 = math.exp %193 : vector<2x256xf32>
    %cst_33 = arith.constant 1.000000e+00 : f32
    %195 = vector.broadcast %cst_33 : f32 to vector<2x256xf32>
    %196 = arith.addf %195, %194 : vector<2x256xf32>
    %197 = arith.divf %195, %196 : vector<2x256xf32>
    %198 = vector.extract_strided_slice %197 {offsets = [0, 0], sizes = [2, 20], strides = [1, 1]} : vector<2x256xf32> to vector<2x20xf32>
    %199 = vector.extract_strided_slice %197 {offsets = [0, 128], sizes = [2, 20], strides = [1, 1]} : vector<2x256xf32> to vector<2x20xf32>
    %200 = vector.extract_strided_slice %187 {offsets = [0, 256], sizes = [2, 20], strides = [1, 1]} : vector<2x384xf32> to vector<2x20xf32>
    %201 = vector.extract_strided_slice %189 {offsets = [0, 256], sizes = [2, 20], strides = [1, 1]} : vector<2x384xf32> to vector<2x20xf32>
    %202 = arith.addf %201, %7 : vector<2x20xf32>
    %203 = arith.mulf %198, %202 : vector<2x20xf32>
    %204 = arith.addf %200, %203 : vector<2x20xf32>
    %205 = math.tanh %204 : vector<2x20xf32>
    %cst_34 = arith.constant 1.000000e+00 : f32
    %206 = vector.broadcast %cst_34 : f32 to vector<2x20xf32>
    %207 = arith.subf %206, %199 : vector<2x20xf32>
    %208 = arith.mulf %207, %205 : vector<2x20xf32>
    %209 = arith.mulf %199, %186 : vector<2x20xf32>
    %210 = arith.addf %208, %209 : vector<2x20xf32>
    %211 = math.tanh %210 : vector<2x20xf32>
    %212 = arith.truncf %211 : vector<2x20xf32> to vector<2x20xbf16>
    %cst_35 = arith.constant dense<0.000000e+00> : vector<2x512xf32>
    %213 = tpu.matmul %212, %3, %cst_35 {dimension_numbers = #tpu.dot_dimension_numbers<[1], [0], [0], [1], [0, 0, 1, 1], [], []>} : vector<2x20xbf16>, vector<20x512xbf16>, vector<2x512xf32> -> vector<2x512xf32>
    %214 = arith.addf %213, %13 : vector<2x512xf32>
    %215 = vector.extract_strided_slice %214 {offsets = [0, 384], sizes = [2, 13], strides = [1, 1]} : vector<2x512xf32> to vector<2x13xf32>
    %216 = math.tanh %215 : vector<2x13xf32>
    %217 = arith.truncf %216 : vector<2x13xf32> to vector<2x13xbf16>
    %cst_36 = arith.constant dense<0.000000e+00> : vector<2x384xf32>
    %218 = tpu.matmul %217, %2, %cst_36 {dimension_numbers = #tpu.dot_dimension_numbers<[1], [0], [0], [1], [0, 0, 1, 1], [], []>} : vector<2x13xbf16>, vector<13x384xbf16>, vector<2x384xf32> -> vector<2x384xf32>
    %219 = arith.addf %218, %10 : vector<2x384xf32>
    %220 = vector.extract_strided_slice %219 {offsets = [0, 0], sizes = [2, 256], strides = [1, 1]} : vector<2x384xf32> to vector<2x256xf32>
    %221 = vector.extract_strided_slice %214 {offsets = [0, 0], sizes = [2, 256], strides = [1, 1]} : vector<2x512xf32> to vector<2x256xf32>
    %222 = arith.addf %220, %221 : vector<2x256xf32>
    %223 = arith.negf %222 : vector<2x256xf32>
    %224 = math.exp %223 : vector<2x256xf32>
    %cst_37 = arith.constant 1.000000e+00 : f32
    %225 = vector.broadcast %cst_37 : f32 to vector<2x256xf32>
    %226 = arith.addf %225, %224 : vector<2x256xf32>
    %227 = arith.divf %225, %226 : vector<2x256xf32>
    %228 = vector.extract_strided_slice %227 {offsets = [0, 0], sizes = [2, 20], strides = [1, 1]} : vector<2x256xf32> to vector<2x20xf32>
    %229 = vector.extract_strided_slice %227 {offsets = [0, 128], sizes = [2, 20], strides = [1, 1]} : vector<2x256xf32> to vector<2x20xf32>
    %230 = vector.extract_strided_slice %219 {offsets = [0, 256], sizes = [2, 20], strides = [1, 1]} : vector<2x384xf32> to vector<2x20xf32>
    %231 = vector.extract_strided_slice %214 {offsets = [0, 256], sizes = [2, 20], strides = [1, 1]} : vector<2x512xf32> to vector<2x20xf32>
    %232 = arith.mulf %228, %231 : vector<2x20xf32>
    %233 = arith.addf %230, %232 : vector<2x20xf32>
    %234 = math.tanh %233 : vector<2x20xf32>
    %cst_38 = arith.constant 1.000000e+00 : f32
    %235 = vector.broadcast %cst_38 : f32 to vector<2x20xf32>
    %236 = arith.subf %235, %229 : vector<2x20xf32>
    %237 = arith.mulf %236, %234 : vector<2x20xf32>
    %238 = arith.mulf %229, %211 : vector<2x20xf32>
    %239 = arith.addf %237, %238 : vector<2x20xf32>
    %240 = math.tanh %239 : vector<2x20xf32>
    %241 = arith.truncf %240 : vector<2x20xf32> to vector<2x20xbf16>
    %cst_39 = arith.constant dense<0.000000e+00> : vector<2x512xf32>
    %242 = tpu.matmul %241, %3, %cst_39 {dimension_numbers = #tpu.dot_dimension_numbers<[1], [0], [0], [1], [0, 0, 1, 1], [], []>} : vector<2x20xbf16>, vector<20x512xbf16>, vector<2x512xf32> -> vector<2x512xf32>
    %243 = arith.addf %242, %13 : vector<2x512xf32>
    %244 = vector.extract_strided_slice %243 {offsets = [0, 384], sizes = [2, 13], strides = [1, 1]} : vector<2x512xf32> to vector<2x13xf32>
    %245 = math.tanh %244 : vector<2x13xf32>
    %246 = arith.truncf %245 : vector<2x13xf32> to vector<2x13xbf16>
    %cst_40 = arith.constant dense<0.000000e+00> : vector<2x384xf32>
    %247 = tpu.matmul %246, %2, %cst_40 {dimension_numbers = #tpu.dot_dimension_numbers<[1], [0], [0], [1], [0, 0, 1, 1], [], []>} : vector<2x13xbf16>, vector<13x384xbf16>, vector<2x384xf32> -> vector<2x384xf32>
    %248 = arith.addf %247, %10 : vector<2x384xf32>
    %249 = vector.extract_strided_slice %248 {offsets = [0, 0], sizes = [2, 256], strides = [1, 1]} : vector<2x384xf32> to vector<2x256xf32>
    %250 = vector.extract_strided_slice %243 {offsets = [0, 0], sizes = [2, 256], strides = [1, 1]} : vector<2x512xf32> to vector<2x256xf32>
    %251 = arith.addf %249, %250 : vector<2x256xf32>
    %252 = arith.negf %251 : vector<2x256xf32>
    %253 = math.exp %252 : vector<2x256xf32>
    %cst_41 = arith.constant 1.000000e+00 : f32
    %254 = vector.broadcast %cst_41 : f32 to vector<2x256xf32>
    %255 = arith.addf %254, %253 : vector<2x256xf32>
    %256 = arith.divf %254, %255 : vector<2x256xf32>
    %257 = vector.extract_strided_slice %256 {offsets = [0, 0], sizes = [2, 20], strides = [1, 1]} : vector<2x256xf32> to vector<2x20xf32>
    %258 = vector.extract_strided_slice %256 {offsets = [0, 128], sizes = [2, 20], strides = [1, 1]} : vector<2x256xf32> to vector<2x20xf32>
    %259 = vector.extract_strided_slice %248 {offsets = [0, 256], sizes = [2, 20], strides = [1, 1]} : vector<2x384xf32> to vector<2x20xf32>
    %260 = vector.extract_strided_slice %243 {offsets = [0, 256], sizes = [2, 20], strides = [1, 1]} : vector<2x512xf32> to vector<2x20xf32>
    %261 = arith.mulf %257, %260 : vector<2x20xf32>
    %262 = arith.addf %259, %261 : vector<2x20xf32>
    %263 = math.tanh %262 : vector<2x20xf32>
    %cst_42 = arith.constant 1.000000e+00 : f32
    %264 = vector.broadcast %cst_42 : f32 to vector<2x20xf32>
    %265 = arith.subf %264, %258 : vector<2x20xf32>
    %266 = arith.mulf %265, %263 : vector<2x20xf32>
    %267 = arith.mulf %258, %240 : vector<2x20xf32>
    %268 = arith.addf %266, %267 : vector<2x20xf32>
    %269 = math.tanh %268 : vector<2x20xf32>
    %270 = arith.truncf %269 : vector<2x20xf32> to vector<2x20xbf16>
    %cst_43 = arith.constant dense<0.000000e+00> : vector<2x512xf32>
    %271 = tpu.matmul %270, %3, %cst_43 {dimension_numbers = #tpu.dot_dimension_numbers<[1], [0], [0], [1], [0, 0, 1, 1], [], []>} : vector<2x20xbf16>, vector<20x512xbf16>, vector<2x512xf32> -> vector<2x512xf32>
    %272 = arith.addf %271, %13 : vector<2x512xf32>
    %273 = vector.extract_strided_slice %272 {offsets = [0, 384], sizes = [2, 13], strides = [1, 1]} : vector<2x512xf32> to vector<2x13xf32>
    %274 = math.tanh %273 : vector<2x13xf32>
    %275 = arith.truncf %274 : vector<2x13xf32> to vector<2x13xbf16>
    %cst_44 = arith.constant dense<0.000000e+00> : vector<2x384xf32>
    %276 = tpu.matmul %275, %2, %cst_44 {dimension_numbers = #tpu.dot_dimension_numbers<[1], [0], [0], [1], [0, 0, 1, 1], [], []>} : vector<2x13xbf16>, vector<13x384xbf16>, vector<2x384xf32> -> vector<2x384xf32>
    %277 = arith.addf %276, %10 : vector<2x384xf32>
    %278 = vector.extract_strided_slice %277 {offsets = [0, 0], sizes = [2, 256], strides = [1, 1]} : vector<2x384xf32> to vector<2x256xf32>
    %279 = vector.extract_strided_slice %272 {offsets = [0, 0], sizes = [2, 256], strides = [1, 1]} : vector<2x512xf32> to vector<2x256xf32>
    %280 = arith.addf %278, %279 : vector<2x256xf32>
    %281 = arith.negf %280 : vector<2x256xf32>
    %282 = math.exp %281 : vector<2x256xf32>
    %cst_45 = arith.constant 1.000000e+00 : f32
    %283 = vector.broadcast %cst_45 : f32 to vector<2x256xf32>
    %284 = arith.addf %283, %282 : vector<2x256xf32>
    %285 = arith.divf %283, %284 : vector<2x256xf32>
    %286 = vector.extract_strided_slice %285 {offsets = [0, 0], sizes = [2, 20], strides = [1, 1]} : vector<2x256xf32> to vector<2x20xf32>
    %287 = vector.extract_strided_slice %285 {offsets = [0, 128], sizes = [2, 20], strides = [1, 1]} : vector<2x256xf32> to vector<2x20xf32>
    %288 = vector.extract_strided_slice %277 {offsets = [0, 256], sizes = [2, 20], strides = [1, 1]} : vector<2x384xf32> to vector<2x20xf32>
    %289 = vector.extract_strided_slice %272 {offsets = [0, 256], sizes = [2, 20], strides = [1, 1]} : vector<2x512xf32> to vector<2x20xf32>
    %290 = arith.mulf %286, %289 : vector<2x20xf32>
    %291 = arith.addf %288, %290 : vector<2x20xf32>
    %292 = math.tanh %291 : vector<2x20xf32>
    %cst_46 = arith.constant 1.000000e+00 : f32
    %293 = vector.broadcast %cst_46 : f32 to vector<2x20xf32>
    %294 = arith.subf %293, %287 : vector<2x20xf32>
    %295 = arith.mulf %294, %292 : vector<2x20xf32>
    %296 = arith.mulf %287, %269 : vector<2x20xf32>
    %297 = arith.addf %295, %296 : vector<2x20xf32>
    %298 = math.tanh %297 : vector<2x20xf32>
    %299 = arith.truncf %298 : vector<2x20xf32> to vector<2x20xbf16>
    %cst_47 = arith.constant dense<0.000000e+00> : vector<2x512xf32>
    %300 = tpu.matmul %299, %3, %cst_47 {dimension_numbers = #tpu.dot_dimension_numbers<[1], [0], [0], [1], [0, 0, 1, 1], [], []>} : vector<2x20xbf16>, vector<20x512xbf16>, vector<2x512xf32> -> vector<2x512xf32>
    %301 = arith.addf %300, %13 : vector<2x512xf32>
    %302 = vector.extract_strided_slice %301 {offsets = [0, 384], sizes = [2, 13], strides = [1, 1]} : vector<2x512xf32> to vector<2x13xf32>
    %303 = math.tanh %302 : vector<2x13xf32>
    %304 = arith.truncf %303 : vector<2x13xf32> to vector<2x13xbf16>
    %cst_48 = arith.constant dense<0.000000e+00> : vector<2x384xf32>
    %305 = tpu.matmul %304, %2, %cst_48 {dimension_numbers = #tpu.dot_dimension_numbers<[1], [0], [0], [1], [0, 0, 1, 1], [], []>} : vector<2x13xbf16>, vector<13x384xbf16>, vector<2x384xf32> -> vector<2x384xf32>
    %306 = arith.addf %305, %10 : vector<2x384xf32>
    %307 = vector.extract_strided_slice %306 {offsets = [0, 0], sizes = [2, 256], strides = [1, 1]} : vector<2x384xf32> to vector<2x256xf32>
    %308 = vector.extract_strided_slice %301 {offsets = [0, 0], sizes = [2, 256], strides = [1, 1]} : vector<2x512xf32> to vector<2x256xf32>
    %309 = arith.addf %307, %308 : vector<2x256xf32>
    %310 = arith.negf %309 : vector<2x256xf32>
    %311 = math.exp %310 : vector<2x256xf32>
    %cst_49 = arith.constant 1.000000e+00 : f32
    %312 = vector.broadcast %cst_49 : f32 to vector<2x256xf32>
    %313 = arith.addf %312, %311 : vector<2x256xf32>
    %314 = arith.divf %312, %313 : vector<2x256xf32>
    %315 = vector.extract_strided_slice %314 {offsets = [0, 0], sizes = [2, 20], strides = [1, 1]} : vector<2x256xf32> to vector<2x20xf32>
    %316 = vector.extract_strided_slice %314 {offsets = [0, 128], sizes = [2, 20], strides = [1, 1]} : vector<2x256xf32> to vector<2x20xf32>
    %317 = vector.extract_strided_slice %306 {offsets = [0, 256], sizes = [2, 20], strides = [1, 1]} : vector<2x384xf32> to vector<2x20xf32>
    %318 = vector.extract_strided_slice %301 {offsets = [0, 256], sizes = [2, 20], strides = [1, 1]} : vector<2x512xf32> to vector<2x20xf32>
    %319 = arith.mulf %315, %318 : vector<2x20xf32>
    %320 = arith.addf %317, %319 : vector<2x20xf32>
    %321 = math.tanh %320 : vector<2x20xf32>
    %cst_50 = arith.constant 1.000000e+00 : f32
    %322 = vector.broadcast %cst_50 : f32 to vector<2x20xf32>
    %323 = arith.subf %322, %316 : vector<2x20xf32>
    %324 = arith.mulf %323, %321 : vector<2x20xf32>
    %325 = arith.mulf %316, %298 : vector<2x20xf32>
    %326 = arith.addf %324, %325 : vector<2x20xf32>
    %327 = math.tanh %326 : vector<2x20xf32>
    %328 = arith.truncf %327 : vector<2x20xf32> to vector<2x20xbf16>
    %cst_51 = arith.constant dense<0.000000e+00> : vector<2x512xf32>
    %329 = tpu.matmul %328, %3, %cst_51 {dimension_numbers = #tpu.dot_dimension_numbers<[1], [0], [0], [1], [0, 0, 1, 1], [], []>} : vector<2x20xbf16>, vector<20x512xbf16>, vector<2x512xf32> -> vector<2x512xf32>
    %330 = arith.addf %329, %13 : vector<2x512xf32>
    %331 = vector.extract_strided_slice %330 {offsets = [0, 384], sizes = [2, 13], strides = [1, 1]} : vector<2x512xf32> to vector<2x13xf32>
    %332 = math.tanh %331 : vector<2x13xf32>
    %333 = arith.truncf %332 : vector<2x13xf32> to vector<2x13xbf16>
    %cst_52 = arith.constant dense<0.000000e+00> : vector<2x384xf32>
    %334 = tpu.matmul %333, %2, %cst_52 {dimension_numbers = #tpu.dot_dimension_numbers<[1], [0], [0], [1], [0, 0, 1, 1], [], []>} : vector<2x13xbf16>, vector<13x384xbf16>, vector<2x384xf32> -> vector<2x384xf32>
    %335 = arith.addf %334, %10 : vector<2x384xf32>
    %336 = vector.extract_strided_slice %335 {offsets = [0, 0], sizes = [2, 256], strides = [1, 1]} : vector<2x384xf32> to vector<2x256xf32>
    %337 = vector.extract_strided_slice %330 {offsets = [0, 0], sizes = [2, 256], strides = [1, 1]} : vector<2x512xf32> to vector<2x256xf32>
    %338 = arith.addf %336, %337 : vector<2x256xf32>
    %339 = arith.negf %338 : vector<2x256xf32>
    %340 = math.exp %339 : vector<2x256xf32>
    %cst_53 = arith.constant 1.000000e+00 : f32
    %341 = vector.broadcast %cst_53 : f32 to vector<2x256xf32>
    %342 = arith.addf %341, %340 : vector<2x256xf32>
    %343 = arith.divf %341, %342 : vector<2x256xf32>
    %344 = vector.extract_strided_slice %343 {offsets = [0, 0], sizes = [2, 20], strides = [1, 1]} : vector<2x256xf32> to vector<2x20xf32>
    %345 = vector.extract_strided_slice %343 {offsets = [0, 128], sizes = [2, 20], strides = [1, 1]} : vector<2x256xf32> to vector<2x20xf32>
    %346 = vector.extract_strided_slice %335 {offsets = [0, 256], sizes = [2, 20], strides = [1, 1]} : vector<2x384xf32> to vector<2x20xf32>
    %347 = vector.extract_strided_slice %330 {offsets = [0, 256], sizes = [2, 20], strides = [1, 1]} : vector<2x512xf32> to vector<2x20xf32>
    %348 = arith.mulf %344, %347 : vector<2x20xf32>
    %349 = arith.addf %346, %348 : vector<2x20xf32>
    %350 = math.tanh %349 : vector<2x20xf32>
    %cst_54 = arith.constant 1.000000e+00 : f32
    %351 = vector.broadcast %cst_54 : f32 to vector<2x20xf32>
    %352 = arith.subf %351, %345 : vector<2x20xf32>
    %353 = arith.mulf %352, %350 : vector<2x20xf32>
    %354 = arith.mulf %345, %327 : vector<2x20xf32>
    %355 = arith.addf %353, %354 : vector<2x20xf32>
    %356 = math.tanh %355 : vector<2x20xf32>
    %357 = arith.truncf %356 : vector<2x20xf32> to vector<2x20xbf16>
    %cst_55 = arith.constant dense<0.000000e+00> : vector<2x512xf32>
    %358 = tpu.matmul %357, %3, %cst_55 {dimension_numbers = #tpu.dot_dimension_numbers<[1], [0], [0], [1], [0, 0, 1, 1], [], []>} : vector<2x20xbf16>, vector<20x512xbf16>, vector<2x512xf32> -> vector<2x512xf32>
    %359 = arith.addf %358, %13 : vector<2x512xf32>
    %360 = vector.extract_strided_slice %359 {offsets = [0, 384], sizes = [2, 13], strides = [1, 1]} : vector<2x512xf32> to vector<2x13xf32>
    %361 = math.tanh %360 : vector<2x13xf32>
    %362 = arith.truncf %361 : vector<2x13xf32> to vector<2x13xbf16>
    %cst_56 = arith.constant dense<0.000000e+00> : vector<2x384xf32>
    %363 = tpu.matmul %362, %2, %cst_56 {dimension_numbers = #tpu.dot_dimension_numbers<[1], [0], [0], [1], [0, 0, 1, 1], [], []>} : vector<2x13xbf16>, vector<13x384xbf16>, vector<2x384xf32> -> vector<2x384xf32>
    %364 = arith.addf %363, %10 : vector<2x384xf32>
    %365 = vector.extract_strided_slice %364 {offsets = [0, 0], sizes = [2, 256], strides = [1, 1]} : vector<2x384xf32> to vector<2x256xf32>
    %366 = vector.extract_strided_slice %359 {offsets = [0, 0], sizes = [2, 256], strides = [1, 1]} : vector<2x512xf32> to vector<2x256xf32>
    %367 = arith.addf %365, %366 : vector<2x256xf32>
    %368 = arith.negf %367 : vector<2x256xf32>
    %369 = math.exp %368 : vector<2x256xf32>
    %cst_57 = arith.constant 1.000000e+00 : f32
    %370 = vector.broadcast %cst_57 : f32 to vector<2x256xf32>
    %371 = arith.addf %370, %369 : vector<2x256xf32>
    %372 = arith.divf %370, %371 : vector<2x256xf32>
    %373 = vector.extract_strided_slice %372 {offsets = [0, 0], sizes = [2, 20], strides = [1, 1]} : vector<2x256xf32> to vector<2x20xf32>
    %374 = vector.extract_strided_slice %372 {offsets = [0, 128], sizes = [2, 20], strides = [1, 1]} : vector<2x256xf32> to vector<2x20xf32>
    %375 = vector.extract_strided_slice %364 {offsets = [0, 256], sizes = [2, 20], strides = [1, 1]} : vector<2x384xf32> to vector<2x20xf32>
    %376 = vector.extract_strided_slice %359 {offsets = [0, 256], sizes = [2, 20], strides = [1, 1]} : vector<2x512xf32> to vector<2x20xf32>
    %377 = arith.mulf %373, %376 : vector<2x20xf32>
    %378 = arith.addf %375, %377 : vector<2x20xf32>
    %379 = math.tanh %378 : vector<2x20xf32>
    %cst_58 = arith.constant 1.000000e+00 : f32
    %380 = vector.broadcast %cst_58 : f32 to vector<2x20xf32>
    %381 = arith.subf %380, %374 : vector<2x20xf32>
    %382 = arith.mulf %381, %379 : vector<2x20xf32>
    %383 = arith.mulf %374, %356 : vector<2x20xf32>
    %384 = arith.addf %382, %383 : vector<2x20xf32>
    %385 = math.tanh %384 : vector<2x20xf32>
    %386 = arith.truncf %385 : vector<2x20xf32> to vector<2x20xbf16>
    %cst_59 = arith.constant dense<0.000000e+00> : vector<2x512xf32>
    %387 = tpu.matmul %386, %3, %cst_59 {dimension_numbers = #tpu.dot_dimension_numbers<[1], [0], [0], [1], [0, 0, 1, 1], [], []>} : vector<2x20xbf16>, vector<20x512xbf16>, vector<2x512xf32> -> vector<2x512xf32>
    %388 = arith.addf %387, %13 : vector<2x512xf32>
    %389 = vector.extract_strided_slice %388 {offsets = [0, 384], sizes = [2, 13], strides = [1, 1]} : vector<2x512xf32> to vector<2x13xf32>
    %390 = math.tanh %389 : vector<2x13xf32>
    %391 = arith.truncf %390 : vector<2x13xf32> to vector<2x13xbf16>
    %cst_60 = arith.constant dense<0.000000e+00> : vector<2x384xf32>
    %392 = tpu.matmul %391, %2, %cst_60 {dimension_numbers = #tpu.dot_dimension_numbers<[1], [0], [0], [1], [0, 0, 1, 1], [], []>} : vector<2x13xbf16>, vector<13x384xbf16>, vector<2x384xf32> -> vector<2x384xf32>
    %393 = arith.addf %392, %10 : vector<2x384xf32>
    %394 = vector.extract_strided_slice %393 {offsets = [0, 0], sizes = [2, 256], strides = [1, 1]} : vector<2x384xf32> to vector<2x256xf32>
    %395 = vector.extract_strided_slice %388 {offsets = [0, 0], sizes = [2, 256], strides = [1, 1]} : vector<2x512xf32> to vector<2x256xf32>
    %396 = arith.addf %394, %395 : vector<2x256xf32>
    %397 = arith.negf %396 : vector<2x256xf32>
    %398 = math.exp %397 : vector<2x256xf32>
    %cst_61 = arith.constant 1.000000e+00 : f32
    %399 = vector.broadcast %cst_61 : f32 to vector<2x256xf32>
    %400 = arith.addf %399, %398 : vector<2x256xf32>
    %401 = arith.divf %399, %400 : vector<2x256xf32>
    %402 = vector.extract_strided_slice %401 {offsets = [0, 0], sizes = [2, 20], strides = [1, 1]} : vector<2x256xf32> to vector<2x20xf32>
    %403 = vector.extract_strided_slice %401 {offsets = [0, 128], sizes = [2, 20], strides = [1, 1]} : vector<2x256xf32> to vector<2x20xf32>
    %404 = vector.extract_strided_slice %393 {offsets = [0, 256], sizes = [2, 20], strides = [1, 1]} : vector<2x384xf32> to vector<2x20xf32>
    %405 = vector.extract_strided_slice %388 {offsets = [0, 256], sizes = [2, 20], strides = [1, 1]} : vector<2x512xf32> to vector<2x20xf32>
    %406 = arith.mulf %402, %405 : vector<2x20xf32>
    %407 = arith.addf %404, %406 : vector<2x20xf32>
    %408 = math.tanh %407 : vector<2x20xf32>
    %cst_62 = arith.constant 1.000000e+00 : f32
    %409 = vector.broadcast %cst_62 : f32 to vector<2x20xf32>
    %410 = arith.subf %409, %403 : vector<2x20xf32>
    %411 = arith.mulf %410, %408 : vector<2x20xf32>
    %412 = arith.mulf %403, %385 : vector<2x20xf32>
    %413 = arith.addf %411, %412 : vector<2x20xf32>
    %414 = math.tanh %413 : vector<2x20xf32>
    %415 = arith.truncf %414 : vector<2x20xf32> to vector<2x20xbf16>
    %cst_63 = arith.constant dense<0.000000e+00> : vector<2x512xf32>
    %416 = tpu.matmul %415, %3, %cst_63 {dimension_numbers = #tpu.dot_dimension_numbers<[1], [0], [0], [1], [0, 0, 1, 1], [], []>} : vector<2x20xbf16>, vector<20x512xbf16>, vector<2x512xf32> -> vector<2x512xf32>
    %417 = arith.addf %416, %13 : vector<2x512xf32>
    %418 = vector.extract_strided_slice %417 {offsets = [0, 384], sizes = [2, 13], strides = [1, 1]} : vector<2x512xf32> to vector<2x13xf32>
    %419 = math.tanh %418 : vector<2x13xf32>
    %420 = tpu.concatenate %419, %390, %361, %332, %303, %274, %245, %216 in 0 : vector<2x13xf32>, vector<2x13xf32>, vector<2x13xf32>, vector<2x13xf32>, vector<2x13xf32>, vector<2x13xf32>, vector<2x13xf32>, vector<2x13xf32> -> vector<16x13xf32>
    %c0_64 = arith.constant 0 : index
    %c0_65 = arith.constant 0 : index
    %421 = vector.load %arg3[%c0_64, %c0_65] : memref<16x13xf32, #tpu.memory_space<vmem>>, vector<16x13xf32>
    tpu.vector_store %arg3[%c0_64, %c0_65], %420 {strides = array<i32>} : memref<16x13xf32, #tpu.memory_space<vmem>>, vector<16x13xf32>,
    return
  }
}

</mosaic_0001>

<bundles_post_ra>
// kernel: gru_ae_forward.1
= control target key start
LH: loop header
LB: loop body
LE: loop exit
PB: predicated region body
PF: predicated region fallthrough
CT: control target
= control target key end

     0   :  { %vm122_vm0 = vcmask 1045504   ;;  %vm123_vm1 = vcmask 1046528   ;;  %v3240_v0 = vmov 65535   ;;  %v3241_v2 = vmov 0   ;;  %s3821_s1 = inlined_call_operand.vmem [shape: bf16[80,512], index: 1, kind: input, shape index: {}]   ;;  %s3822_s0 = inlined_call_operand.vmem [shape: bf16[16,13], index: 0, kind: input, shape index: {}]   ;;  %s3823_s2 = inlined_call_operand.vmem [shape: f32[4,512], index: 2, kind: input, shape index: {}]   ;;  %s3824_s3 = inlined_call_operand.vmem [shape: f32[16,13], index: 3, kind: output, shape index: {}]  }
   0x1   :  { %v124_v1 = vsel %vm122_vm0, 4294967295, %v3240_v0  ;;  %167 = vmatprep.mubr.bf16.mxu0 %v3241_v2  ;;  %v3032_v3 = vld [vmem:[%s3821_s1 + $0x4] ss:$16 sps:$4 sm:$0x7f]   ;;  %v44_v7 = vlaneseq  ;;  %vm118_vm2 = vcmask 105472   ;;  %v3242_v12 = vmov 0.0  }
   0x2   :  { %v3269_v4 = vsel %vm123_vm1, %v124_v1, 0  ;;  %v3038_v6 = vld [vmem:[%s3821_s1] ss:$16 sps:$4 sm:$0x7f]   ;;  %v3282_v10 = vld [vmem:[%s3821_s1 + $0x24] ss:$16 sps:$4 sm:$0xff]   ;;  %2860 = vmatprep.subr.bf16.mxu1 %v3242_v12 }
   0x3   :  { %v130_v5 = vand.u32 %v3032_v3, %v3269_v4  ;;  %v3039_v8 = vld [vmem:[%s3822_s0] sm:$0xff]   ;;  %v127_v9 = vand.u32 %v3038_v6, %v3269_v4  ;;  %vm3243_vm3 = vmmov 0   ;;  %v3045_v14 = vld [vmem:[%s3821_s1 + $0x8] ss:$16 sps:$4 sm:$0x7f]   ;;  %v3298_v15 = vshrl.u32 %v44_v7, 7 }
   0x4   :  { %v3287_v11 = vld [vmem:[%s3821_s1 + $0x20] ss:$16 sps:$4 sm:$0xff]   ;;  %2862 = vmatprep.mubr.msk.bf16.mxu1 %vm3243_vm3, %v3242_v12  ;;  %vm247_vm4 = vcmask 1041408   ;;  %v133_v18 = vand.u32 %v3045_v14, %v3269_v4  ;;  %v3313_v20 = vld [vmem:[%s3821_s1 + $0x28] ss:$16 sps:$4 sm:$0xff]   ;;  %vm243_vm5 = vcmask 162816  }
   0x5   :  { %135 = vmatprep.subr.bf16.mxu0 %v130_v5  ;;  %v23_v13 = vld [vmem:[%s3821_s1 + $0x40] sm:$0x33]  ;;  %v2699_v19 = vld [vmem:[%s3823_s2 + $0x2] ss:$4 sm:$0x7]  ;;  %v46_v21 = vsub.s32 0, %v3298_v15 }
   0x6   :  { %136 = vmatpush1.bf16.msra.mxu0 %v127_v9  ;;  %v3301_v16 = vcombine.high %v23_v13, %v23_v13  ;;  %v2710_v17 = vcombine.low %v23_v13, %v23_v13  ;;  %2861 = vmatpush3.bf16.msra.mxu1 %v133_v18  ;;  %v3047_v23 = vld [vmem:[%s3821_s1 + $0x48] ss:$0 sps:$4 sm:$0x33]   ;;  %v3354_v26 = vld [vmem:[%s3823_s2 + $0x3] ss:$4 sm:$0xf] }
   0x7   :  { %257 = vmatprep.subr.bf16.mxu0 %v3282_v10  ;;  %2866 = vmatprep.subr.bf16.mxu1 %v3242_v12  ;;  %v47_v24 = vrot.slane %v2699_v19, %v46_v21  ;;  %v3332_v25 = vsel %vm247_vm4, %v3047_v23, 0  ;;  %v65_v27 = vrot.slane %v3354_v26, %v46_v21  ;;  %v50_v28 = vsub.s32 1, %v3298_v15  ;;  %v35_v35 = vld [vmem:[%s3823_s2] ss:$4 sm:$0x7] }
   0x8   :  { %v3319_v22 = vsel %vm247_vm4, %v2710_v17, 0  ;;  %v3364_v33 = vsub.s32 2, %v3298_v15  ;;  %v88_v37 = vrot.slane %v35_v35, %v46_v21  ;;  %v3388_v5 = vld [vmem:[%s3823_s2 + $0x9] ss:$0 sm:$0xff]  ;;  %vm2686_vm6 = vcmask 1043456  }
   0x9   :  { %2705 = vmatmul.mubr.msk.bf16.vlgmr.msra.gmra.mrb[0].mxu0 %vm118_vm2, %v3039_v8  ;;  %2863 = vmatmul.mubr.msk.bf16.vlgmr.msra.gmra.mrb[0].mxu1 %vm118_vm2, %v3039_v8  ;;  %v3358_v29 = vadd.f32 %v65_v27, %v47_v24  ;;  %v51_v30 = vrot.slane %v2699_v19, %v50_v28  ;;  %v69_v31 = vrot.slane %v3354_v26, %v50_v28 }
   0xa   :  { %258 = vmatpush1.bf16.msra.mxu0 %v3287_v11  ;;  %289 = vmatprep.mubr.bf16.mxu0 %v3241_v2  ;;  %v3367_v34 = vrot.slane %v2699_v19, %v3364_v33  ;;  %v92_v39 = vrot.slane %v35_v35, %v50_v28  ;;  %v96_v44 = vrot.slane %v35_v35, %v3364_v33 }
   0xb   :  { %2713 = vmatprep.subr.msk.bf16.mxu0 %vm247_vm4, %v3301_v16  ;;  %2867 = vmatpush3.bf16.msra.mxu1 %v3313_v20  ;;  %v3361_v32 = vadd.f32 %v69_v31, %v51_v30 }
   0xc   :  { %2870 = vmatprep.mubr.msk.bf16.mxu1 %vm3243_vm3, %v3242_v12  ;;  %2868 = vmatprep.subr.bf16.mxu1 %v3242_v12 }
   0xe   :  { %260 = vmatpush1.bf16.msra.mxu0 %v3319_v22 }
   0xf   :  { %364 = vmatprep.subr.bf16.mxu0 %v3282_v10  ;;  %2869 = vmatpush3.bf16.msra.mxu1 %v3332_v25 }
  0x10   :  { %2874 = vmatprep.subr.bf16.mxu1 %v3242_v12 }
  0x11   :  { %290 = vmatmul.mubr.bf16.vlgmr.msra.gmra.mrb[4].mxu0 %v3241_v2 }
  0x12   :  { %365 = vmatpush1.bf16.msra.mxu0 %v3287_v11  ;;  %396 = vmatprep.mubr.bf16.mxu0 %v3241_v2 }
  0x13   :  { %2716 = vmatprep.subr.msk.bf16.mxu0 %vm247_vm4, %v3301_v16  ;;  %2871 = vmatmul.mubr.bf16.vlgmr.msra.gmra.mrb[4].mxu1 %v3241_v2 }
  0x14   :  { %2875 = vmatpush3.bf16.msra.mxu1 %v3313_v20  ;;  %2878 = vmatprep.mubr.msk.bf16.mxu1 %vm3243_vm3, %v3242_v12 }
  0x15   :  { %2876 = vmatprep.subr.bf16.mxu1 %v3242_v12 }
  0x16   :  { %367 = vmatpush1.bf16.msra.mxu0 %v3319_v22 }
  0x17   :  { %485 = vmatprep.subr.bf16.mxu0 %v3282_v10 }
  0x18   :  { %2877 = vmatpush3.bf16.msra.mxu1 %v3332_v25 }
  0x19   :  { %2882 = vmatprep.subr.bf16.mxu1 %v3242_v12 }
  0xdc   :  { %v169_v36 = vpop.f32.mrb[0].mxu0  ;;  %v212_v45 = vpop.f32.mrb[0].mxu1 }
  0xdd   :  { %v171_v38 = vpop.f32.mrb[1].mxu0  ;;  %v2864_v46 = vpop.f32.mrb[1].mxu1  ;;  %v3377_v47 = vadd.f32 %v169_v36, %v88_v37  ;;  %v3391_v9 = vadd.f32 %v212_v45, %v96_v44 }
  0xde   :  { %v173_v40 = vpop.f32.mrb[2].mxu0  ;;  %v215_v48 = vpop.f32.mrb[2].mxu1  ;;  %v3382_v54 = vadd.f32 %v171_v38, %v92_v39 }
  0xdf   :  { %v3372_v41 = vadd.f32 %v173_v40, %v88_v37  ;;  %v175_v42 = vpop.f32.mrb[3].mxu0  ;;  %v3379_v50 = vadd.f32 %v215_v48, %v96_v44  ;;  %v2865_v51 = vpop.f32.mrb[3].mxu1 }
  0xe0   :  { %v3374_v43 = vadd.f32 %v175_v42, %v92_v39 }
  0xe4   :  { %v291_v49 = vpop.f32.mrb[4].mxu0 }
  0xe5   :  { %v338_v52 = vadd.f32 %v291_v49, %v3377_v47  ;;  %v293_v53 = vpop.f32.mrb[5].mxu0 }
  0xe6   :  { %v295_v55 = vpop.f32.mrb[6].mxu0  ;;  %v339_v58 = vadd.f32 %v293_v53, %v3382_v54  ;;  %v332_v59 = vpop.f32.mrb[4].mxu1 }
  0xe7   :  { %v2714_v56 = vmul.f32 -1.442695, %v338_v52  ;;  %v296_v57 = vpop.f32.mrb[7].mxu0  ;;  %v2872_v60 = vpop.f32.mrb[5].mxu1  ;;  %v352_v7 = vadd.f32 %v3388_v5, %v332_v59 }
  0xe8   :  { %v335_v61 = vpop.f32.mrb[6].mxu1  ;;  %v2715_v62 = vmul.f32 -1.442695, %v339_v58 }
  0xe9   :  { %3058 = vpow2.f32 %v2714_v56  ;;  %v2873_v63 = vpop.f32.mrb[7].mxu1 }
  0xea   :  { %3060 = vpow2.f32 %v2715_v62 }
  0xf3   :  { %v3059_v0 = vpop.eup %3058 }
  0xf4   :  { %v346_v1 = vadd.f32 1.0, %v3059_v0  ;;  %v3061_v3 = vpop.eup %3060 }
  0xf5   :  { %v347_v6 = vadd.f32 1.0, %v3061_v3 }
  0xf6   :  { %3062 = vrcp.f32 %v346_v1 }
  0xf7   :  { %3064 = vrcp.f32 %v347_v6 }
 0x100   :  { %v3063_v8 = vpop.eup %3062 }
 0x101   :  { %v353_v13 = vmul.f32 %v3063_v8, %v352_v7  ;;  %v3065_v17 = vpop.eup %3064 }
 0x102   :  { %v356_v18 = vsub.f32 1.0, %v3065_v17  ;;  %v358_v21 = vmul.f32 0.0, %v3065_v17 }
 0x103   :  { %v354_v14 = vadd.f32 %v353_v13, %v3391_v9 }
 0x105   :  { %3066 = vtanh.f32 %v354_v14 }
 0x10f   :  { %v3067_v19 = vpop.eup %3066 }
 0x110   :  { %v357_v23 = vmul.f32 %v3067_v19, %v356_v18 }
 0x112   :  { %v359_v24 = vadd.f32 %v358_v21, %v357_v23 }
 0x114   :  { %v360_v27 = vpack.c.bf16 %v359_v24, %v359_v24  ;;  %v475_v58 = vrot.slane %v359_v24, 6 }
 0x116   :  { %2717 = vmatmul.mubr.msk.bf16.vlgmr.msra.gmra.mrb[8].mxu0 %vm243_vm5, %v360_v27  ;;  %2879 = vmatmul.mubr.msk.bf16.vlgmr.msra.gmra.mrb[8].mxu1 %vm243_vm5, %v360_v27 }
 0x117   :  { %486 = vmatpush1.bf16.msra.mxu0 %v3287_v11  ;;  %2883 = vmatpush3.bf16.msra.mxu1 %v3313_v20 }
 0x118   :  { %2721 = vmatprep.subr.msk.bf16.mxu0 %vm247_vm4, %v3301_v16  ;;  %2884 = vmatprep.subr.bf16.mxu1 %v3242_v12 }
 0x119   :  { %517 = vmatprep.mubr.bf16.mxu0 %v3241_v2  ;;  %2886 = vmatprep.mubr.msk.bf16.mxu1 %vm3243_vm3, %v3242_v12 }
 0x11b   :  { %488 = vmatpush1.bf16.msra.mxu0 %v3319_v22  ;;  %2885 = vmatpush3.bf16.msra.mxu1 %v3332_v25 }
 0x11c   :  { %606 = vmatprep.subr.bf16.mxu0 %v3282_v10  ;;  %2890 = vmatprep.subr.bf16.mxu1 %v3242_v12 }
 0x1e9   :  { %v398_v28 = vpop.f32.mrb[8].mxu0  ;;  %v439_v30 = vpop.f32.mrb[8].mxu1 }
 0x1ea   :  { %v447_v31 = vrot.slane %v398_v28, 6  ;;  %v400_v35 = vpop.f32.mrb[9].mxu0  ;;  %v2880_v36 = vpop.f32.mrb[9].mxu1  ;;  %v465_v55 = vadd.f32 %v3388_v5, %v439_v30 }
 0x1eb   :  { %v448_v37 = vrot.slane %v400_v35, 6  ;;  %v402_v38 = vpop.f32.mrb[10].mxu0  ;;  %v442_v39 = vpop.f32.mrb[10].mxu1 }
 0x1ec   :  { %v451_v40 = vadd.f32 %v447_v31, %v3377_v47  ;;  %v403_v42 = vpop.f32.mrb[11].mxu0  ;;  %v2881_v44 = vpop.f32.mrb[11].mxu1  ;;  %v467_v56 = vrot.slane %v465_v55, 6 }
 0x1ed   :  { %v452_v45 = vadd.f32 %v448_v37, %v3382_v54 }
 0x1ee   :  { %v2719_v46 = vmul.f32 -1.442695, %v451_v40 }
 0x1ef   :  { %v2720_v48 = vmul.f32 -1.442695, %v452_v45 }
 0x1f0   :  { %3068 = vpow2.f32 %v2719_v46 }
 0x1f1   :  { %3070 = vpow2.f32 %v2720_v48 }
 0x1fa   :  { %v3069_v49 = vpop.eup %3068 }
 0x1fb   :  { %v3071_v51 = vpop.eup %3070  ;;  %v459_v52 = vadd.f32 1.0, %v3069_v49 }
 0x1fc   :  { %v460_v53 = vadd.f32 1.0, %v3071_v51 }
 0x1fd   :  { %3072 = vrcp.f32 %v459_v52 }
 0x1fe   :  { %3074 = vrcp.f32 %v460_v53 }
 0x207   :  { %v3073_v57 = vpop.eup %3072 }
 0x208   :  { %v3075_v59 = vpop.eup %3074  ;;  %v469_v60 = vmul.f32 %v3073_v57, %v467_v56 }
 0x209   :  { %v477_v61 = vmul.f32 %v3075_v59, %v475_v58  ;;  %v472_v63 = vsub.f32 1.0, %v3075_v59 }
 0x20a   :  { %v470_v62 = vadd.f32 %v469_v60, %v3391_v9 }
 0x20c   :  { %3076 = vtanh.f32 %v470_v62 }
 0x216   :  { %v3077_v0 = vpop.eup %3076 }
 0x217   :  { %v473_v1 = vmul.f32 %v3077_v0, %v472_v63 }
 0x219   :  { %v478_v3 = vadd.f32 %v477_v61, %v473_v1 }
 0x21b   :  { %v479_v6 = vpack.c.bf16 %v478_v3, %v478_v3  ;;  %v596_v45 = vrot.slane %v478_v3, 6 }
 0x21d   :  { %v481_v7 = vrot.slane %v479_v6, 1 }
 0x21f   :  { %2722 = vmatmul.mubr.msk.bf16.vlgmr.msra.gmra.mrb[12].mxu0 %vm243_vm5, %v481_v7  ;;  %2887 = vmatmul.mubr.msk.bf16.vlgmr.msra.gmra.mrb[12].mxu1 %vm243_vm5, %v481_v7 }
 0x220   :  { %607 = vmatpush1.bf16.msra.mxu0 %v3287_v11  ;;  %2891 = vmatpush3.bf16.msra.mxu1 %v3313_v20 }
 0x221   :  { %2726 = vmatprep.subr.msk.bf16.mxu0 %vm247_vm4, %v3301_v16  ;;  %2892 = vmatprep.subr.bf16.mxu1 %v3242_v12 }
 0x222   :  { %638 = vmatprep.mubr.bf16.mxu0 %v3241_v2  ;;  %2894 = vmatprep.mubr.msk.bf16.mxu1 %vm3243_vm3, %v3242_v12 }
 0x224   :  { %609 = vmatpush1.bf16.msra.mxu0 %v3319_v22  ;;  %2893 = vmatpush3.bf16.msra.mxu1 %v3332_v25 }
 0x225   :  { %727 = vmatprep.subr.bf16.mxu0 %v3282_v10  ;;  %2898 = vmatprep.subr.bf16.mxu1 %v3242_v12 }
 0x2f2   :  { %v519_v8 = vpop.f32.mrb[12].mxu0  ;;  %v560_v13 = vpop.f32.mrb[12].mxu1 }
 0x2f3   :  { %v568_v14 = vrot.slane %v519_v8, 4  ;;  %v521_v17 = vpop.f32.mrb[13].mxu0  ;;  %v2888_v18 = vpop.f32.mrb[13].mxu1  ;;  %v586_v40 = vadd.f32 %v3388_v5, %v560_v13 }
 0x2f4   :  { %v569_v19 = vrot.slane %v521_v17, 4  ;;  %v523_v21 = vpop.f32.mrb[14].mxu0  ;;  %v563_v23 = vpop.f32.mrb[14].mxu1 }
 0x2f5   :  { %v572_v24 = vadd.f32 %v568_v14, %v3377_v47  ;;  %v524_v27 = vpop.f32.mrb[15].mxu0  ;;  %v2889_v28 = vpop.f32.mrb[15].mxu1  ;;  %v588_v42 = vrot.slane %v586_v40, 4 }
 0x2f6   :  { %v573_v30 = vadd.f32 %v569_v19, %v3382_v54 }
 0x2f7   :  { %v2724_v31 = vmul.f32 -1.442695, %v572_v24 }
 0x2f8   :  { %v2725_v35 = vmul.f32 -1.442695, %v573_v30 }
 0x2f9   :  { %3078 = vpow2.f32 %v2724_v31 }
 0x2fa   :  { %3080 = vpow2.f32 %v2725_v35 }
 0x303   :  { %v3079_v36 = vpop.eup %3078 }
 0x304   :  { %v3081_v37 = vpop.eup %3080  ;;  %v580_v38 = vadd.f32 1.0, %v3079_v36 }
 0x305   :  { %v581_v39 = vadd.f32 1.0, %v3081_v37 }
 0x306   :  { %3082 = vrcp.f32 %v580_v38 }
 0x307   :  { %3084 = vrcp.f32 %v581_v39 }
 0x310   :  { %v3083_v44 = vpop.eup %3082 }
 0x311   :  { %v3085_v46 = vpop.eup %3084  ;;  %v590_v48 = vmul.f32 %v3083_v44, %v588_v42 }
 0x312   :  { %v598_v49 = vmul.f32 %v3085_v46, %v596_v45  ;;  %v593_v52 = vsub.f32 1.0, %v3085_v46 }
 0x313   :  { %v591_v51 = vadd.f32 %v590_v48, %v3391_v9 }
 0x315   :  { %3086 = vtanh.f32 %v591_v51 }
 0x31f   :  { %v3087_v53 = vpop.eup %3086 }
 0x320   :  { %v594_v55 = vmul.f32 %v3087_v53, %v593_v52 }
 0x322   :  { %v599_v56 = vadd.f32 %v598_v49, %v594_v55 }
 0x324   :  { %v600_v57 = vpack.c.bf16 %v599_v56, %v599_v56  ;;  %v717_v30 = vrot.slane %v599_v56, 6 }
 0x326   :  { %v602_v58 = vrot.slane %v600_v57, 2 }
 0x328   :  { %2727 = vmatmul.mubr.msk.bf16.vlgmr.msra.gmra.mrb[16].mxu0 %vm243_vm5, %v602_v58  ;;  %2895 = vmatmul.mubr.msk.bf16.vlgmr.msra.gmra.mrb[16].mxu1 %vm243_vm5, %v602_v58 }
 0x329   :  { %728 = vmatpush1.bf16.msra.mxu0 %v3287_v11  ;;  %2899 = vmatpush3.bf16.msra.mxu1 %v3313_v20 }
 0x32a   :  { %2731 = vmatprep.subr.msk.bf16.mxu0 %vm247_vm4, %v3301_v16  ;;  %2900 = vmatprep.subr.bf16.mxu1 %v3242_v12 }
 0x32b   :  { %759 = vmatprep.mubr.bf16.mxu0 %v3241_v2  ;;  %2902 = vmatprep.mubr.msk.bf16.mxu1 %vm3243_vm3, %v3242_v12 }
 0x32d   :  { %730 = vmatpush1.bf16.msra.mxu0 %v3319_v22  ;;  %2901 = vmatpush3.bf16.msra.mxu1 %v3332_v25 }
 0x32e   :  { %837 = vmatprep.subr.bf16.mxu0 %v3282_v10  ;;  %2906 = vmatprep.subr.bf16.mxu1 %v3242_v12 }
 0x3fb   :  { %v640_v59 = vpop.f32.mrb[16].mxu0  ;;  %v681_v60 = vpop.f32.mrb[16].mxu1 }
 0x3fc   :  { %v689_v61 = vrot.slane %v640_v59, 2  ;;  %v642_v62 = vpop.f32.mrb[17].mxu0  ;;  %v2896_v63 = vpop.f32.mrb[17].mxu1  ;;  %v707_v24 = vadd.f32 %v3388_v5, %v681_v60 }
 0x3fd   :  { %v690_v0 = vrot.slane %v642_v62, 2  ;;  %v644_v1 = vpop.f32.mrb[18].mxu0  ;;  %v684_v3 = vpop.f32.mrb[18].mxu1 }
 0x3fe   :  { %v693_v6 = vadd.f32 %v689_v61, %v3377_v47  ;;  %v645_v7 = vpop.f32.mrb[19].mxu0  ;;  %v2897_v8 = vpop.f32.mrb[19].mxu1  ;;  %v709_v27 = vrot.slane %v707_v24, 2 }
 0x3ff   :  { %v694_v13 = vadd.f32 %v690_v0, %v3382_v54 }
 0x400   :  { %v2729_v14 = vmul.f32 -1.442695, %v693_v6 }
 0x401   :  { %v2730_v17 = vmul.f32 -1.442695, %v694_v13 }
 0x402   :  { %3088 = vpow2.f32 %v2729_v14 }
 0x403   :  { %3090 = vpow2.f32 %v2730_v17 }
 0x40c   :  { %v3089_v18 = vpop.eup %3088 }
 0x40d   :  { %v3091_v19 = vpop.eup %3090  ;;  %v701_v21 = vadd.f32 1.0, %v3089_v18 }
 0x40e   :  { %v702_v23 = vadd.f32 1.0, %v3091_v19 }
 0x40f   :  { %3092 = vrcp.f32 %v701_v21 }
 0x410   :  { %3094 = vrcp.f32 %v702_v23 }
 0x419   :  { %v3093_v28 = vpop.eup %3092 }
 0x41a   :  { %v3095_v47 = vpop.eup %3094  ;;  %v711_v31 = vmul.f32 %v3093_v28, %v709_v27 }
 0x41b   :  { %v719_v35 = vmul.f32 %v3095_v47, %v717_v30  ;;  %v714_v36 = vsub.f32 1.0, %v3095_v47 }
 0x41c   :  { %v712_v54 = vadd.f32 %v711_v31, %v3391_v9 }
 0x41e   :  { %3096 = vtanh.f32 %v712_v54 }
 0x428   :  { %v3097_v37 = vpop.eup %3096 }
 0x429   :  { %v715_v38 = vmul.f32 %v3097_v37, %v714_v36 }
 0x42b   :  { %v720_v39 = vadd.f32 %v719_v35, %v715_v38 }
 0x42d   :  { %v721_v40 = vpack.c.bf16 %v720_v39, %v720_v39  ;;  %v829_v0 = vrot.slane %v720_v39, 6 }
 0x42f   :  { %v723_v42 = vrot.slane %v721_v40, 3 }
 0x431   :  { %2732 = vmatmul.mubr.msk.bf16.vlgmr.msra.gmra.mrb[20].mxu0 %vm243_vm5, %v723_v42  ;;  %2903 = vmatmul.mubr.msk.bf16.vlgmr.msra.gmra.mrb[20].mxu1 %vm243_vm5, %v723_v42 }
 0x432   :  { %838 = vmatpush1.bf16.msra.mxu0 %v3287_v11  ;;  %2907 = vmatpush3.bf16.msra.mxu1 %v3313_v20 }
 0x433   :  { %2736 = vmatprep.subr.msk.bf16.mxu0 %vm247_vm4, %v3301_v16  ;;  %2908 = vmatprep.subr.bf16.mxu1 %v3242_v12 }
 0x434   :  { %869 = vmatprep.mubr.bf16.mxu0 %v3241_v2  ;;  %2910 = vmatprep.mubr.msk.bf16.mxu1 %vm3243_vm3, %v3242_v12 }
 0x436   :  { %840 = vmatpush1.bf16.msra.mxu0 %v3319_v22  ;;  %2909 = vmatpush3.bf16.msra.mxu1 %v3332_v25 }
 0x437   :  { %958 = vmatprep.subr.bf16.mxu0 %v3282_v10  ;;  %2914 = vmatprep.subr.bf16.mxu1 %v3242_v12 }
 0x504   :  { %v761_v9 = vpop.f32.mrb[20].mxu0  ;;  %v802_v44 = vpop.f32.mrb[20].mxu1 }
 0x505   :  { %v808_v45 = vadd.f32 %v761_v9, %v3372_v41  ;;  %v763_v46 = vpop.f32.mrb[21].mxu0  ;;  %v2904_v48 = vpop.f32.mrb[21].mxu1  ;;  %v822_v62 = vadd.f32 %v3388_v5, %v802_v44 }
 0x506   :  { %v809_v49 = vadd.f32 %v763_v46, %v3374_v43  ;;  %v765_v51 = vpop.f32.mrb[22].mxu0  ;;  %v805_v52 = vpop.f32.mrb[22].mxu1 }
 0x507   :  { %v2734_v53 = vmul.f32 -1.442695, %v808_v45  ;;  %v766_v55 = vpop.f32.mrb[23].mxu0  ;;  %v2905_v56 = vpop.f32.mrb[23].mxu1 }
 0x508   :  { %v2735_v57 = vmul.f32 -1.442695, %v809_v49 }
 0x509   :  { %3098 = vpow2.f32 %v2734_v53 }
 0x50a   :  { %3100 = vpow2.f32 %v2735_v57 }
 0x513   :  { %v3099_v58 = vpop.eup %3098 }
 0x514   :  { %v3101_v59 = vpop.eup %3100  ;;  %v816_v60 = vadd.f32 1.0, %v3099_v58 }
 0x515   :  { %v817_v61 = vadd.f32 1.0, %v3101_v59 }
 0x516   :  { %3102 = vrcp.f32 %v816_v60 }
 0x517   :  { %3104 = vrcp.f32 %v817_v61 }
 0x520   :  { %v3103_v63 = vpop.eup %3102 }
 0x521   :  { %v3105_v1 = vpop.eup %3104  ;;  %v823_v3 = vmul.f32 %v3103_v63, %v822_v62 }
 0x522   :  { %v831_v6 = vmul.f32 %v3105_v1, %v829_v0  ;;  %v826_v8 = vsub.f32 1.0, %v3105_v1 }
 0x523   :  { %v824_v7 = vadd.f32 %v823_v3, %v3379_v50 }
 0x525   :  { %3106 = vtanh.f32 %v824_v7 }
 0x52f   :  { %v3107_v13 = vpop.eup %3106 }
 0x530   :  { %v827_v14 = vmul.f32 %v3107_v13, %v826_v8 }
 0x532   :  { %v832_v17 = vadd.f32 %v831_v6, %v827_v14 }
 0x534   :  { %v833_v18 = vpack.c.bf16 %v832_v17, %v832_v17  ;;  %v948_v46 = vrot.slane %v832_v17, 6 }
 0x536   :  { %2737 = vmatmul.mubr.msk.bf16.vlgmr.msra.gmra.mrb[24].mxu0 %vm243_vm5, %v833_v18  ;;  %2911 = vmatmul.mubr.msk.bf16.vlgmr.msra.gmra.mrb[24].mxu1 %vm243_vm5, %v833_v18 }
 0x537   :  { %959 = vmatpush1.bf16.msra.mxu0 %v3287_v11  ;;  %2915 = vmatpush3.bf16.msra.mxu1 %v3313_v20 }
 0x538   :  { %2741 = vmatprep.subr.msk.bf16.mxu0 %vm247_vm4, %v3301_v16  ;;  %2916 = vmatprep.subr.bf16.mxu1 %v3242_v12 }
 0x539   :  { %990 = vmatprep.mubr.bf16.mxu0 %v3241_v2  ;;  %2918 = vmatprep.mubr.msk.bf16.mxu1 %vm3243_vm3, %v3242_v12 }
 0x53b   :  { %961 = vmatpush1.bf16.msra.mxu0 %v3319_v22  ;;  %2917 = vmatpush3.bf16.msra.mxu1 %v3332_v25 }
 0x53c   :  { %1079 = vmatprep.subr.bf16.mxu0 %v3282_v10  ;;  %2922 = vmatprep.subr.bf16.mxu1 %v3242_v12 }
 0x609   :  { %v871_v19 = vpop.f32.mrb[24].mxu0  ;;  %v912_v21 = vpop.f32.mrb[24].mxu1 }
 0x60a   :  { %v920_v23 = vrot.slane %v871_v19, 6  ;;  %v873_v24 = vpop.f32.mrb[25].mxu0  ;;  %v2912_v27 = vpop.f32.mrb[25].mxu1  ;;  %v938_v9 = vadd.f32 %v3388_v5, %v912_v21 }
 0x60b   :  { %v921_v28 = vrot.slane %v873_v24, 6  ;;  %v875_v30 = vpop.f32.mrb[26].mxu0  ;;  %v915_v47 = vpop.f32.mrb[26].mxu1 }
 0x60c   :  { %v924_v31 = vadd.f32 %v920_v23, %v3372_v41  ;;  %v876_v35 = vpop.f32.mrb[27].mxu0  ;;  %v2913_v54 = vpop.f32.mrb[27].mxu1  ;;  %v940_v44 = vrot.slane %v938_v9, 6  ;;  %v33_v9 = vld [vmem:[%s3821_s1 + $0x90] sm:$0x33] }
 0x60d   :  { %v925_v36 = vadd.f32 %v921_v28, %v3374_v43 }
 0x60e   :  { %v2739_v37 = vmul.f32 -1.442695, %v924_v31 }
 0x60f   :  { %v2740_v38 = vmul.f32 -1.442695, %v925_v36 }
 0x610   :  { %3108 = vpow2.f32 %v2739_v37 }
 0x611   :  { %3110 = vpow2.f32 %v2740_v38  ;;  %v3036_v38 = vld [vmem:[%s3821_s1 + $0x54] ss:$16 sps:$4 sm:$0x7f]  }
 0x61a   :  { %v3109_v10 = vpop.eup %3108 }
 0x61b   :  { %v3111_v39 = vpop.eup %3110  ;;  %v932_v40 = vadd.f32 1.0, %v3109_v10  ;;  %v3510_v10 = vld [vmem:[%s3821_s1 + $0x74] ss:$16 sps:$4 sm:$0xff]  }
 0x61c   :  { %v933_v42 = vadd.f32 1.0, %v3111_v39  ;;  %v3515_v39 = vld [vmem:[%s3821_s1 + $0x7c] ss:$16 sps:$4 sm:$0xff]  }
 0x61d   :  { %3112 = vrcp.f32 %v932_v40  ;;  %v3520_v40 = vld [vmem:[%s3821_s1 + $0x70] ss:$16 sps:$4 sm:$0xff]  }
 0x61e   :  { %3114 = vrcp.f32 %v933_v42  ;;  %v3525_v42 = vld [vmem:[%s3821_s1 + $0x78] ss:$16 sps:$4 sm:$0xff]  }
 0x627   :  { %v3113_v45 = vpop.eup %3112 }
 0x628   :  { %v3115_v48 = vpop.eup %3114  ;;  %v942_v49 = vmul.f32 %v3113_v45, %v940_v44  ;;  %v34_v44 = vld [vmem:[%s3821_s1 + $0x98] sm:$0x33]  ;;  %v3535_v45 = vcombine.high %v33_v9, %v33_v9 }
 0x629   :  { %v950_v51 = vmul.f32 %v3115_v48, %v948_v46  ;;  %v945_v53 = vsub.f32 1.0, %v3115_v48  ;;  %v3537_v46 = vcombine.high %v34_v44, %v34_v44  ;;  %v2755_v48 = vcombine.low %v33_v9, %v33_v9 }
 0x62a   :  { %v943_v52 = vadd.f32 %v942_v49, %v3379_v50  ;;  %v2757_v49 = vcombine.low %v34_v44, %v34_v44 }
 0x62c   :  { %3116 = vtanh.f32 %v943_v52  ;;  %v3549_v52 = vsel %vm247_vm4, %v2755_v48, 0 }
 0x636   :  { %v3117_v55 = vpop.eup %3116 }
 0x637   :  { %v946_v56 = vmul.f32 %v3117_v55, %v945_v53  ;;  %v3552_v53 = vsel %vm247_vm4, %v2757_v49, 0 }
 0x639   :  { %v951_v57 = vadd.f32 %v950_v51, %v946_v56  ;;  %v3542_v51 = vand.u32 %v3036_v38, %v3269_v4 }
 0x63b   :  { %v952_v58 = vpack.c.bf16 %v951_v57, %v951_v57  ;;  %v1069_v23 = vrot.slane %v951_v57, 6 }
 0x63d   :  { %v954_v59 = vrot.slane %v952_v58, 1 }
 0x63f   :  { %2742 = vmatmul.mubr.msk.bf16.vlgmr.msra.gmra.mrb[28].mxu0 %vm243_vm5, %v954_v59  ;;  %2919 = vmatmul.mubr.msk.bf16.vlgmr.msra.gmra.mrb[28].mxu1 %vm243_vm5, %v954_v59 }
 0x640   :  { %1080 = vmatpush1.bf16.msra.mxu0 %v3287_v11  ;;  %2923 = vmatpush3.bf16.msra.mxu1 %v3313_v20 }
 0x641   :  { %2746 = vmatprep.subr.msk.bf16.mxu0 %vm247_vm4, %v3301_v16  ;;  %2924 = vmatprep.subr.bf16.mxu1 %v3242_v12 }
 0x642   :  { %1111 = vmatprep.mubr.bf16.mxu0 %v3241_v2  ;;  %2926 = vmatprep.mubr.msk.bf16.mxu1 %vm3243_vm3, %v3242_v12 }
 0x644   :  { %1082 = vmatpush1.bf16.msra.mxu0 %v3319_v22  ;;  %2925 = vmatpush3.bf16.msra.mxu1 %v3332_v25 }
 0x645   :  { %1243 = vmatprep.subr.bf16.mxu0 %v3510_v10  ;;  %1284 = vmatprep.subr.bf16.mxu1 %v3515_v39 }
 0x712   :  { %v992_v60 = vpop.f32.mrb[28].mxu0  ;;  %v1033_v61 = vpop.f32.mrb[28].mxu1 }
 0x713   :  { %v1041_v62 = vrot.slane %v992_v60, 4  ;;  %v994_v11 = vpop.f32.mrb[29].mxu0  ;;  %v2920_v63 = vpop.f32.mrb[29].mxu1  ;;  %v1059_v18 = vadd.f32 %v3388_v5, %v1033_v61 }
 0x714   :  { %v1042_v20 = vrot.slane %v994_v11, 4  ;;  %v996_v0 = vpop.f32.mrb[30].mxu0  ;;  %v1036_v1 = vpop.f32.mrb[30].mxu1 }
 0x715   :  { %v1045_v16 = vadd.f32 %v1041_v62, %v3372_v41  ;;  %v997_v3 = vpop.f32.mrb[31].mxu0  ;;  %v2921_v6 = vpop.f32.mrb[31].mxu1  ;;  %v1061_v19 = vrot.slane %v1059_v18, 4 }
 0x716   :  { %v1046_v7 = vadd.f32 %v1042_v20, %v3374_v43 }
 0x717   :  { %v2744_v8 = vmul.f32 -1.442695, %v1045_v16 }
 0x718   :  { %v2745_v13 = vmul.f32 -1.442695, %v1046_v7 }
 0x719   :  { %3118 = vpow2.f32 %v2744_v8 }
 0x71a   :  { %3120 = vpow2.f32 %v2745_v13 }
 0x723   :  { %v3119_v22 = vpop.eup %3118 }
 0x724   :  { %v3121_v25 = vpop.eup %3120  ;;  %v1053_v14 = vadd.f32 1.0, %v3119_v22 }
 0x725   :  { %v1054_v17 = vadd.f32 1.0, %v3121_v25 }
 0x726   :  { %3122 = vrcp.f32 %v1053_v14 }
 0x727   :  { %3124 = vrcp.f32 %v1054_v17 }
 0x730   :  { %v3123_v21 = vpop.eup %3122 }
 0x731   :  { %v3125_v24 = vpop.eup %3124  ;;  %v1063_v27 = vmul.f32 %v3123_v21, %v1061_v19 }
 0x732   :  { %v1071_v28 = vmul.f32 %v3125_v24, %v1069_v23  ;;  %v1066_v47 = vsub.f32 1.0, %v3125_v24 }
 0x733   :  { %v1064_v30 = vadd.f32 %v1063_v27, %v3379_v50  ;;  %v3034_v27 = vld [vmem:[%s3821_s1 + $0x50] ss:$16 sps:$4 sm:$0x7f]  }
 0x735   :  { %3126 = vtanh.f32 %v1064_v30 }
 0x73f   :  { %v3127_v31 = vpop.eup %3126 }
 0x740   :  { %v1067_v35 = vmul.f32 %v3127_v31, %v1066_v47 }
 0x742   :  { %v1072_v54 = vadd.f32 %v1071_v28, %v1067_v35 }
 0x744   :  { %v1073_v36 = vpack.c.bf16 %v1072_v54, %v1072_v54  ;;  %v1190_v14 = vrot.slane %v1072_v54, 6 }
 0x746   :  { %v1075_v37 = vrot.slane %v1073_v36, 2 }
 0x748   :  { %2747 = vmatmul.mubr.msk.bf16.vlgmr.msra.gmra.mrb[32].mxu0 %vm243_vm5, %v1075_v37  ;;  %2927 = vmatmul.mubr.msk.bf16.vlgmr.msra.gmra.mrb[32].mxu1 %vm243_vm5, %v1075_v37 }
 0x749   :  { %1275 = vmatprep.mubr.bf16.mxu0 %v3241_v2  ;;  %1316 = vmatprep.mubr.bf16.mxu1 %v3241_v2 }
 0x74a   :  { %1244 = vmatpush1.bf16.msra.mxu0 %v3520_v40  ;;  %1285 = vmatpush1.bf16.msra.mxu1 %v3525_v42 }
 0x74b   :  { %2759 = vmatprep.subr.msk.bf16.mxu0 %vm247_vm4, %v3535_v45  ;;  %2761 = vmatprep.subr.msk.bf16.mxu1 %vm247_vm4, %v3537_v46 }
 0x74e   :  { %1246 = vmatpush1.bf16.msra.mxu0 %v3549_v52  ;;  %1287 = vmatpush1.bf16.msra.mxu1 %v3552_v53 }
 0x74f   :  { %1352 = vmatprep.subr.bf16.mxu0 %v3542_v51  ;;  %2930 = vmatprep.subr.bf16.mxu1 %v3242_v12 }
 0x81b   :  { %v1113_v55 = vpop.f32.mrb[32].mxu0  ;;  %v1154_v56 = vpop.f32.mrb[32].mxu1 }
 0x81c   :  { %v1162_v57 = vrot.slane %v1113_v55, 2  ;;  %v1115_v58 = vpop.f32.mrb[33].mxu0  ;;  %v2928_v59 = vpop.f32.mrb[33].mxu1  ;;  %v1180_v13 = vadd.f32 %v3388_v5, %v1154_v56  ;;  %v3037_v5 = vld [vmem:[%s3821_s1 + $0x58] ss:$16 sps:$4 sm:$0x7f]  }
 0x81d   :  { %v1163_v60 = vrot.slane %v1115_v58, 2  ;;  %v1117_v61 = vpop.f32.mrb[34].mxu0  ;;  %v1157_v62 = vpop.f32.mrb[34].mxu1  ;;  %v3576_v47 = vand.u32 %v3037_v5, %v3269_v4 }
 0x81e   :  { %v1166_v11 = vadd.f32 %v1162_v57, %v3372_v41  ;;  %v1118_v63 = vpop.f32.mrb[35].mxu0  ;;  %v2929_v20 = vpop.f32.mrb[35].mxu1  ;;  %v1182_v22 = vrot.slane %v1180_v13, 2 }
 0x81f   :  { %v1167_v0 = vadd.f32 %v1163_v60, %v3374_v43 }
 0x820   :  { %v2749_v1 = vmul.f32 -1.442695, %v1166_v11 }
 0x821   :  { %v2750_v16 = vmul.f32 -1.442695, %v1167_v0 }
 0x822   :  { %3128 = vpow2.f32 %v2749_v1 }
 0x823   :  { %3130 = vpow2.f32 %v2750_v16 }
 0x82c   :  { %v3129_v3 = vpop.eup %3128 }
 0x82d   :  { %v3131_v6 = vpop.eup %3130  ;;  %v1174_v7 = vadd.f32 1.0, %v3129_v3  ;;  %v3614_v3 = vrot.slane %v3354_v26, %v3364_v33 }
 0x82e   :  { %v1175_v8 = vadd.f32 1.0, %v3131_v6 }
 0x82f   :  { %3132 = vrcp.f32 %v1174_v7 }
 0x830   :  { %3134 = vrcp.f32 %v1175_v8 }
 0x839   :  { %v3133_v25 = vpop.eup %3132 }
 0x83a   :  { %v3135_v41 = vpop.eup %3134  ;;  %v1184_v17 = vmul.f32 %v3133_v25, %v1182_v22 }
 0x83b   :  { %v1192_v18 = vmul.f32 %v3135_v41, %v1190_v14  ;;  %v1187_v19 = vsub.f32 1.0, %v3135_v41 }
 0x83c   :  { %v1185_v43 = vadd.f32 %v1184_v17, %v3379_v50  ;;  %v3573_v50 = vand.u32 %v3034_v27, %v3269_v4  ;;  %v76_v4 = vsub.s32 3, %v3298_v15 }
 0x83e   :  { %3136 = vtanh.f32 %v1185_v43  ;;  %v3589_v35 = vrot.slane %v3354_v26, %v76_v4 }
 0x848   :  { %v3137_v21 = vpop.eup %3136 }
 0x849   :  { %v1188_v23 = vmul.f32 %v3137_v21, %v1187_v19 }
 0x84b   :  { %v1193_v24 = vadd.f32 %v1192_v18, %v1188_v23 }
 0x84d   :  { %3138 = vtanh.f32 %v1193_v24 }
 0x857   :  { %v3568_v28 = vpop.eup %3138 }
 0x858   :  { %v1195_v30 = vpack.c.bf16 %v3568_v28, %v3568_v28  ;;  %v1453_v8 = vrot.slane %v3568_v28, 6 }
 0x85a   :  { %v1197_v31 = vrot.slane %v1195_v30, 3 }
 0x85c   :  { %2760 = vmatmul.mubr.msk.bf16.vlgmr.msra.gmra.mrb[36].mxu0 %vm243_vm5, %v1197_v31  ;;  %2762 = vmatmul.mubr.msk.bf16.vlgmr.msra.gmra.mrb[36].mxu1 %vm243_vm5, %v1197_v31 }
 0x85d   :  { %1353 = vmatpush1.bf16.msra.mxu0 %v3573_v50  ;;  %2931 = vmatpush3.bf16.msra.mxu1 %v3576_v47 }
 0x85e   :  { %1384 = vmatprep.mubr.bf16.mxu0 %v3241_v2  ;;  %2932 = vmatprep.mubr.msk.bf16.mxu1 %vm3243_vm3, %v3242_v12 }
 0x85f   :  { %1462 = vmatprep.subr.bf16.mxu0 %v3510_v10  ;;  %1503 = vmatprep.subr.bf16.mxu1 %v3515_v39 }
 0x92f   :  { %v1318_v54 = vpop.f32.mrb[36].mxu1 }
 0x930   :  { %v1320_v36 = vpop.f32.mrb[37].mxu1  ;;  %v1319_v6 = vadd.f32 %v1318_v54, %v3614_v3 }
 0x931   :  { %v1321_v37 = vadd.f32 %v1320_v36, %v3589_v35  ;;  %v1322_v38 = vpop.f32.mrb[38].mxu1 }
 0x932   :  { %v1323_v9 = vpop.f32.mrb[39].mxu1 }
 0x933   :  { %3140 = vtanh.f32 %v1321_v37 }
 0x93d   :  { %v3592_v44 = vpop.eup %3140 }
 0x93e   :  { %v1326_v48 = vpack.c.bf16 %v3592_v44, %v3592_v44 }
 0x940   :  { %2766 = vmatmul.mubr.msk.bf16.vlgmr.msra.gmra.mrb[36].mxu0 %vm118_vm2, %v1326_v48  ;;  %2933 = vmatmul.mubr.msk.bf16.vlgmr.msra.gmra.mrb[40].mxu1 %vm118_vm2, %v1326_v48 }
 0x941   :  { %1463 = vmatpush1.bf16.msra.mxu0 %v3520_v40  ;;  %1504 = vmatpush1.bf16.msra.mxu1 %v3525_v42 }
 0x942   :  { %2770 = vmatprep.subr.msk.bf16.mxu0 %vm247_vm4, %v3535_v45  ;;  %2772 = vmatprep.subr.msk.bf16.mxu1 %vm247_vm4, %v3537_v46 }
 0x943   :  { %1494 = vmatprep.mubr.bf16.mxu0 %v3241_v2  ;;  %1535 = vmatprep.mubr.bf16.mxu1 %v3241_v2 }
 0x945   :  { %1465 = vmatpush1.bf16.msra.mxu0 %v3549_v52  ;;  %1506 = vmatpush1.bf16.msra.mxu1 %v3552_v53 }
 0x946   :  { %1549 = vmatprep.subr.bf16.mxu0 %v3542_v51  ;;  %2936 = vmatprep.subr.bf16.mxu1 %v3242_v12 }
 0xa13   :  { %v1386_v15 = vpop.f32.mrb[36].mxu0  ;;  %v1427_v49 = vpop.f32.mrb[40].mxu1 }
 0xa14   :  { %v2973_v55 = vadd.f32 %v3358_v29, %v1386_v15  ;;  %v1388_v56 = vpop.f32.mrb[37].mxu0  ;;  %v2934_v57 = vpop.f32.mrb[41].mxu1  ;;  %v1428_v22 = vadd.f32 %v1427_v49, %v3367_v34 }
 0xa15   :  { %v2975_v58 = vadd.f32 %v3361_v32, %v1388_v56  ;;  %v1390_v59 = vpop.f32.mrb[38].mxu0  ;;  %v1430_v60 = vpop.f32.mrb[42].mxu1 }
 0xa16   :  { %v2768_v61 = vmul.f32 -1.442695, %v2973_v55  ;;  %v1391_v62 = vpop.f32.mrb[39].mxu0  ;;  %v2935_v11 = vpop.f32.mrb[43].mxu1 }
 0xa17   :  { %v2769_v63 = vmul.f32 -1.442695, %v2975_v58 }
 0xa18   :  { %3142 = vpow2.f32 %v2768_v61 }
 0xa19   :  { %3144 = vpow2.f32 %v2769_v63 }
 0xa22   :  { %v3143_v20 = vpop.eup %3142 }
 0xa23   :  { %v3145_v0 = vpop.eup %3144  ;;  %v1441_v1 = vadd.f32 1.0, %v3143_v20 }
 0xa24   :  { %v1442_v16 = vadd.f32 1.0, %v3145_v0 }
 0xa25   :  { %3146 = vrcp.f32 %v1441_v1 }
 0xa26   :  { %3148 = vrcp.f32 %v1442_v16 }
 0xa2f   :  { %v3147_v7 = vpop.eup %3146 }
 0xa30   :  { %v3149_v13 = vpop.eup %3148  ;;  %v1447_v25 = vmul.f32 %v3147_v7, %v1319_v6 }
 0xa31   :  { %v1455_v14 = vmul.f32 %v3149_v13, %v1453_v8  ;;  %v1450_v17 = vsub.f32 1.0, %v3149_v13 }
 0xa32   :  { %v1448_v41 = vadd.f32 %v1447_v25, %v1428_v22 }
 0xa34   :  { %3150 = vtanh.f32 %v1448_v41 }
 0xa3e   :  { %v3151_v18 = vpop.eup %3150 }
 0xa3f   :  { %v1451_v43 = vmul.f32 %v3151_v18, %v1450_v17 }
 0xa41   :  { %v1456_v19 = vadd.f32 %v1455_v14, %v1451_v43 }
 0xa43   :  { %3152 = vtanh.f32 %v1456_v19 }
 0xa4d   :  { %v3153_v21 = vpop.eup %3152 }
 0xa4e   :  { %v1458_v26 = vpack.c.bf16 %v3153_v21, %v3153_v21 }
 0xa50   :  { %2771 = vmatmul.mubr.msk.bf16.vlgmr.msra.gmra.mrb[40].mxu0 %vm243_vm5, %v1458_v26  ;;  %2773 = vmatmul.mubr.msk.bf16.vlgmr.msra.gmra.mrb[44].mxu1 %vm243_vm5, %v1458_v26 }
 0xa51   :  { %1550 = vmatpush1.bf16.msra.mxu0 %v3573_v50  ;;  %2937 = vmatpush3.bf16.msra.mxu1 %v3576_v47 }
 0xa52   :  { %1581 = vmatprep.mubr.bf16.mxu0 %v3241_v2  ;;  %2938 = vmatprep.mubr.msk.bf16.mxu1 %vm3243_vm3, %v3242_v12 }
 0xa53   :  { %1656 = vmatprep.subr.bf16.mxu0 %v3510_v10  ;;  %1697 = vmatprep.subr.bf16.mxu1 %v3515_v39 }
 0xb23   :  { %v1537_v33 = vpop.f32.mrb[44].mxu1 }
 0xb24   :  { %v1539_v23 = vpop.f32.mrb[45].mxu1  ;;  %v1538_v61 = vadd.f32 %v1537_v33, %v3614_v3 }
 0xb25   :  { %v1540_v24 = vadd.f32 %v1539_v23, %v3589_v35  ;;  %v1541_v27 = vpop.f32.mrb[46].mxu1 }
 0xb26   :  { %v1542_v5 = vpop.f32.mrb[47].mxu1 }
 0xb27   :  { %3154 = vtanh.f32 %v1540_v24 }
 0xb31   :  { %v3629_v28 = vpop.eup %3154 }
 0xb32   :  { %v1545_v30 = vpack.c.bf16 %v3629_v28, %v3629_v28 }
 0xb34   :  { %2774 = vmatmul.mubr.msk.bf16.vlgmr.msra.gmra.mrb[40].mxu0 %vm118_vm2, %v1545_v30  ;;  %2939 = vmatmul.mubr.msk.bf16.vlgmr.msra.gmra.mrb[48].mxu1 %vm118_vm2, %v1545_v30 }
 0xb35   :  { %1657 = vmatpush1.bf16.msra.mxu0 %v3520_v40  ;;  %1698 = vmatpush1.bf16.msra.mxu1 %v3525_v42 }
 0xb36   :  { %2778 = vmatprep.subr.msk.bf16.mxu0 %vm247_vm4, %v3535_v45  ;;  %2780 = vmatprep.subr.msk.bf16.mxu1 %vm247_vm4, %v3537_v46 }
 0xb37   :  { %1688 = vmatprep.mubr.bf16.mxu0 %v3241_v2  ;;  %1729 = vmatprep.mubr.bf16.mxu1 %v3241_v2 }
 0xb39   :  { %1659 = vmatpush1.bf16.msra.mxu0 %v3549_v52  ;;  %1700 = vmatpush1.bf16.msra.mxu1 %v3552_v53 }
 0xb3a   :  { %1743 = vmatprep.subr.bf16.mxu0 %v3542_v51  ;;  %2942 = vmatprep.subr.bf16.mxu1 %v3242_v12 }
 0xc07   :  { %v1583_v31 = vpop.f32.mrb[40].mxu0  ;;  %v1624_v4 = vpop.f32.mrb[48].mxu1 }
 0xc08   :  { %v2977_v54 = vadd.f32 %v3358_v29, %v1583_v31  ;;  %v1585_v36 = vpop.f32.mrb[41].mxu0  ;;  %v2940_v37 = vpop.f32.mrb[49].mxu1  ;;  %v1625_v11 = vadd.f32 %v1624_v4, %v3367_v34 }
 0xc09   :  { %v1587_v38 = vpop.f32.mrb[42].mxu0  ;;  %v1627_v9 = vpop.f32.mrb[50].mxu1  ;;  %v2979_v55 = vadd.f32 %v3361_v32, %v1585_v36 }
 0xc0a   :  { %v2776_v48 = vmul.f32 -1.442695, %v2977_v54  ;;  %v1588_v15 = vpop.f32.mrb[43].mxu0  ;;  %v2941_v49 = vpop.f32.mrb[51].mxu1 }
 0xc0b   :  { %v2777_v56 = vmul.f32 -1.442695, %v2979_v55 }
 0xc0c   :  { %3156 = vpow2.f32 %v2776_v48 }
 0xc0d   :  { %3158 = vpow2.f32 %v2777_v56 }
 0xc16   :  { %v3157_v57 = vpop.eup %3156 }
 0xc17   :  { %v1638_v58 = vadd.f32 1.0, %v3157_v57  ;;  %v3159_v59 = vpop.eup %3158 }
 0xc18   :  { %v1639_v60 = vadd.f32 1.0, %v3159_v59 }
 0xc19   :  { %3160 = vrcp.f32 %v1638_v58 }
 0xc1a   :  { %3162 = vrcp.f32 %v1639_v60 }
 0xc23   :  { %v3161_v62 = vpop.eup %3160 }
 0xc24   :  { %v1644_v63 = vmul.f32 %v3161_v62, %v1538_v61  ;;  %v3163_v0 = vpop.eup %3162 }
 0xc25   :  { %v1647_v1 = vsub.f32 1.0, %v3163_v0  ;;  %v1649_v7 = vmul.f32 %v3163_v0, %v3153_v21 }
 0xc26   :  { %v1645_v20 = vadd.f32 %v1644_v63, %v1625_v11 }
 0xc28   :  { %3164 = vtanh.f32 %v1645_v20 }
 0xc32   :  { %v3165_v16 = vpop.eup %3164 }
 0xc33   :  { %v1648_v6 = vmul.f32 %v3165_v16, %v1647_v1 }
 0xc35   :  { %v1650_v8 = vadd.f32 %v1649_v7, %v1648_v6 }
 0xc37   :  { %3166 = vtanh.f32 %v1650_v8 }
 0xc41   :  { %v3167_v13 = vpop.eup %3166 }
 0xc42   :  { %v1652_v22 = vpack.c.bf16 %v3167_v13, %v3167_v13 }
 0xc44   :  { %2779 = vmatmul.mubr.msk.bf16.vlgmr.msra.gmra.mrb[44].mxu0 %vm243_vm5, %v1652_v22  ;;  %2781 = vmatmul.mubr.msk.bf16.vlgmr.msra.gmra.mrb[52].mxu1 %vm243_vm5, %v1652_v22  ;;  %v2680_v22 = vrot.slane %v3629_v28, 4 }
 0xc45   :  { %1744 = vmatpush1.bf16.msra.mxu0 %v3573_v50  ;;  %2943 = vmatpush3.bf16.msra.mxu1 %v3576_v47 }
 0xc46   :  { %1775 = vmatprep.mubr.bf16.mxu0 %v3241_v2  ;;  %2944 = vmatprep.mubr.msk.bf16.mxu1 %vm3243_vm3, %v3242_v12 }
 0xc47   :  { %1850 = vmatprep.subr.bf16.mxu0 %v3510_v10  ;;  %1891 = vmatprep.subr.bf16.mxu1 %v3515_v39 }
 0xd17   :  { %v1731_v25 = vpop.f32.mrb[52].mxu1 }
 0xd18   :  { %v1733_v14 = vpop.f32.mrb[53].mxu1  ;;  %v1732_v15 = vadd.f32 %v1731_v25, %v3614_v3  ;;  %v2683_v25 = vrot.slane %v3592_v44, 2 }
 0xd19   :  { %v1734_v41 = vadd.f32 %v1733_v14, %v3589_v35  ;;  %v1735_v17 = vpop.f32.mrb[54].mxu1 }
 0xd1a   :  { %v1736_v18 = vpop.f32.mrb[55].mxu1 }
 0xd1b   :  { %3168 = vtanh.f32 %v1734_v41 }
 0xd25   :  { %v3661_v43 = vpop.eup %3168 }
 0xd26   :  { %v1739_v19 = vpack.c.bf16 %v3661_v43, %v3661_v43  ;;  %v2677_v8 = vrot.slane %v3661_v43, 6 }
 0xd28   :  { %2782 = vmatmul.mubr.msk.bf16.vlgmr.msra.gmra.mrb[44].mxu0 %vm118_vm2, %v1739_v19  ;;  %2945 = vmatmul.mubr.msk.bf16.vlgmr.msra.gmra.mrb[56].mxu1 %vm118_vm2, %v1739_v19 }
 0xd29   :  { %1851 = vmatpush1.bf16.msra.mxu0 %v3520_v40  ;;  %1892 = vmatpush1.bf16.msra.mxu1 %v3525_v42 }
 0xd2a   :  { %2786 = vmatprep.subr.msk.bf16.mxu0 %vm247_vm4, %v3535_v45  ;;  %2788 = vmatprep.subr.msk.bf16.mxu1 %vm247_vm4, %v3537_v46 }
 0xd2b   :  { %1882 = vmatprep.mubr.bf16.mxu0 %v3241_v2  ;;  %1923 = vmatprep.mubr.bf16.mxu1 %v3241_v2 }
 0xd2d   :  { %1853 = vmatpush1.bf16.msra.mxu0 %v3549_v52  ;;  %1894 = vmatpush1.bf16.msra.mxu1 %v3552_v53 }
 0xd2e   :  { %1937 = vmatprep.subr.bf16.mxu0 %v3542_v51  ;;  %2948 = vmatprep.subr.bf16.mxu1 %v3242_v12 }
 0xdfb   :  { %v1777_v21 = vpop.f32.mrb[44].mxu0  ;;  %v1818_v26 = vpop.f32.mrb[56].mxu1 }
 0xdfc   :  { %v2981_v33 = vadd.f32 %v3358_v29, %v1777_v21  ;;  %v1779_v23 = vpop.f32.mrb[45].mxu0  ;;  %v2946_v24 = vpop.f32.mrb[57].mxu1  ;;  %v1819_v55 = vadd.f32 %v1818_v26, %v3367_v34 }
 0xdfd   :  { %v1781_v27 = vpop.f32.mrb[46].mxu0  ;;  %v1821_v5 = vpop.f32.mrb[58].mxu1  ;;  %v2983_v54 = vadd.f32 %v3361_v32, %v1779_v23 }
 0xdfe   :  { %v2784_v30 = vmul.f32 -1.442695, %v2981_v33  ;;  %v1782_v31 = vpop.f32.mrb[47].mxu0  ;;  %v2947_v4 = vpop.f32.mrb[59].mxu1 }
 0xdff   :  { %v2785_v36 = vmul.f32 -1.442695, %v2983_v54 }
 0xe00   :  { %3170 = vpow2.f32 %v2784_v30 }
 0xe01   :  { %3172 = vpow2.f32 %v2785_v36 }
 0xe0a   :  { %v3171_v37 = vpop.eup %3170 }
 0xe0b   :  { %v1832_v38 = vadd.f32 1.0, %v3171_v37  ;;  %v3173_v9 = vpop.eup %3172 }
 0xe0c   :  { %v1833_v48 = vadd.f32 1.0, %v3173_v9 }
 0xe0d   :  { %3174 = vrcp.f32 %v1832_v38 }
 0xe0e   :  { %3176 = vrcp.f32 %v1833_v48 }
 0xe17   :  { %v3175_v49 = vpop.eup %3174 }
 0xe18   :  { %v1838_v56 = vmul.f32 %v3175_v49, %v1732_v15  ;;  %v3177_v58 = vpop.eup %3176 }
 0xe19   :  { %v1841_v59 = vsub.f32 1.0, %v3177_v58  ;;  %v1843_v62 = vmul.f32 %v3177_v58, %v3167_v13 }
 0xe1a   :  { %v1839_v57 = vadd.f32 %v1838_v56, %v1819_v55 }
 0xe1c   :  { %3178 = vtanh.f32 %v1839_v57 }
 0xe26   :  { %v3179_v60 = vpop.eup %3178 }
 0xe27   :  { %v1842_v61 = vmul.f32 %v3179_v60, %v1841_v59 }
 0xe29   :  { %v1844_v11 = vadd.f32 %v1843_v62, %v1842_v61 }
 0xe2b   :  { %3180 = vtanh.f32 %v1844_v11 }
 0xe35   :  { %v3683_v63 = vpop.eup %3180 }
 0xe36   :  { %v1846_v20 = vpack.c.bf16 %v3683_v63, %v3683_v63 }
 0xe38   :  { %2787 = vmatmul.mubr.msk.bf16.vlgmr.msra.gmra.mrb[48].mxu0 %vm243_vm5, %v1846_v20  ;;  %2789 = vmatmul.mubr.msk.bf16.vlgmr.msra.gmra.mrb[60].mxu1 %vm243_vm5, %v1846_v20 }
 0xe39   :  { %1938 = vmatpush1.bf16.msra.mxu0 %v3573_v50  ;;  %2949 = vmatpush3.bf16.msra.mxu1 %v3576_v47 }
 0xe3a   :  { %1969 = vmatprep.mubr.bf16.mxu0 %v3241_v2  ;;  %2950 = vmatprep.mubr.msk.bf16.mxu1 %vm3243_vm3, %v3242_v12 }
 0xe3b   :  { %2044 = vmatprep.subr.bf16.mxu0 %v3510_v10  ;;  %2085 = vmatprep.subr.bf16.mxu1 %v3515_v39 }
 0xf0b   :  { %v1925_v0 = vpop.f32.mrb[60].mxu1 }
 0xf0c   :  { %v1927_v1 = vpop.f32.mrb[61].mxu1  ;;  %v1926_v37 = vadd.f32 %v1925_v0, %v3614_v3 }
 0xf0d   :  { %v1928_v16 = vadd.f32 %v1927_v1, %v3589_v35  ;;  %v1929_v6 = vpop.f32.mrb[62].mxu1 }
 0xf0e   :  { %v1930_v7 = vpop.f32.mrb[63].mxu1 }
 0xf0f   :  { %3182 = vtanh.f32 %v1928_v16 }
 0xf19   :  { %v3183_v13 = vpop.eup %3182 }
 0xf1a   :  { %v2689_v14 = vsel %vm247_vm4, %v3183_v13, %v2677_v8  ;;  %v1933_v41 = vpack.c.bf16 %v3183_v13, %v3183_v13 }
 0xf1b   :  { %v2690_v17 = vsel %vm2686_vm6, %v2689_v14, %v2680_v22 }
 0xf1c   :  { %v2691_v18 = vsel %vm122_vm0, %v2690_v17, %v2683_v25  ;;  %2790 = vmatmul.mubr.msk.bf16.vlgmr.msra.gmra.mrb[48].mxu0 %vm118_vm2, %v1933_v41  ;;  %2951 = vmatmul.mubr.msk.bf16.vlgmr.msra.gmra.mrb[64].mxu1 %vm118_vm2, %v1933_v41 }
 0xf1d   :  { %2693 = vst.msk [vmem:[%s3824_s3 + $0x8] sm:$0xff] %vm118_vm2, %v2691_v18  ;;  %2045 = vmatpush1.bf16.msra.mxu0 %v3520_v40  ;;  %2086 = vmatpush1.bf16.msra.mxu1 %v3525_v42 }
 0xf1e   :  { %2794 = vmatprep.subr.msk.bf16.mxu0 %vm247_vm4, %v3535_v45  ;;  %2796 = vmatprep.subr.msk.bf16.mxu1 %vm247_vm4, %v3537_v46 }
 0xf1f   :  { %2076 = vmatprep.mubr.bf16.mxu0 %v3241_v2  ;;  %2117 = vmatprep.mubr.bf16.mxu1 %v3241_v2 }
 0xf21   :  { %2047 = vmatpush1.bf16.msra.mxu0 %v3549_v52  ;;  %2088 = vmatpush1.bf16.msra.mxu1 %v3552_v53 }
 0xf22   :  { %2131 = vmatprep.subr.bf16.mxu0 %v3542_v51  ;;  %2954 = vmatprep.subr.bf16.mxu1 %v3242_v12 }
 0xfef   :  { %v1971_v44 = vpop.f32.mrb[48].mxu0  ;;  %v2012_v28 = vpop.f32.mrb[64].mxu1 }
 0xff0   :  { %v2985_v43 = vadd.f32 %v3358_v29, %v1971_v44  ;;  %v1973_v19 = vpop.f32.mrb[49].mxu0  ;;  %v2952_v21 = vpop.f32.mrb[65].mxu1  ;;  %v2013_v9 = vadd.f32 %v2012_v28, %v3367_v34 }
 0xff1   :  { %v1975_v26 = vpop.f32.mrb[50].mxu0  ;;  %v2015_v33 = vpop.f32.mrb[66].mxu1  ;;  %v2987_v5 = vadd.f32 %v3361_v32, %v1973_v19 }
 0xff2   :  { %v2792_v23 = vmul.f32 -1.442695, %v2985_v43  ;;  %v1976_v24 = vpop.f32.mrb[51].mxu0  ;;  %v2953_v27 = vpop.f32.mrb[67].mxu1 }
 0xff3   :  { %v2793_v30 = vmul.f32 -1.442695, %v2987_v5 }
 0xff4   :  { %3184 = vpow2.f32 %v2792_v23 }
 0xff5   :  { %3186 = vpow2.f32 %v2793_v30 }
 0xffe   :  { %v3185_v31 = vpop.eup %3184 }
 0xfff   :  { %v2026_v4 = vadd.f32 1.0, %v3185_v31  ;;  %v3187_v54 = vpop.eup %3186 }
0x1000   :  { %v2027_v36 = vadd.f32 1.0, %v3187_v54 }
0x1001   :  { %3188 = vrcp.f32 %v2026_v4 }
0x1002   :  { %3190 = vrcp.f32 %v2027_v36 }
0x100b   :  { %v3189_v38 = vpop.eup %3188 }
0x100c   :  { %v2032_v48 = vmul.f32 %v3189_v38, %v1926_v37  ;;  %v3191_v49 = vpop.eup %3190 }
0x100d   :  { %v2035_v55 = vsub.f32 1.0, %v3191_v49  ;;  %v2037_v58 = vmul.f32 %v3191_v49, %v3683_v63 }
0x100e   :  { %v2033_v15 = vadd.f32 %v2032_v48, %v2013_v9 }
0x1010   :  { %3192 = vtanh.f32 %v2033_v15 }
0x101a   :  { %v3193_v56 = vpop.eup %3192 }
0x101b   :  { %v2036_v57 = vmul.f32 %v3193_v56, %v2035_v55 }
0x101d   :  { %v2038_v59 = vadd.f32 %v2037_v58, %v2036_v57 }
0x101f   :  { %3194 = vtanh.f32 %v2038_v59 }
0x1029   :  { %v3195_v60 = vpop.eup %3194 }
0x102a   :  { %v2040_v61 = vpack.c.bf16 %v3195_v60, %v3195_v60 }
0x102c   :  { %2795 = vmatmul.mubr.msk.bf16.vlgmr.msra.gmra.mrb[52].mxu0 %vm243_vm5, %v2040_v61  ;;  %2797 = vmatmul.mubr.msk.bf16.vlgmr.msra.gmra.mrb[68].mxu1 %vm243_vm5, %v2040_v61 }
0x102d   :  { %2132 = vmatpush1.bf16.msra.mxu0 %v3573_v50  ;;  %2955 = vmatpush3.bf16.msra.mxu1 %v3576_v47 }
0x102e   :  { %2163 = vmatprep.mubr.bf16.mxu0 %v3241_v2  ;;  %2956 = vmatprep.mubr.msk.bf16.mxu1 %vm3243_vm3, %v3242_v12 }
0x102f   :  { %2238 = vmatprep.subr.bf16.mxu0 %v3510_v10  ;;  %2279 = vmatprep.subr.bf16.mxu1 %v3515_v39 }
0x10ff   :  { %v2119_v62 = vpop.f32.mrb[68].mxu1 }
0x1100   :  { %v2121_v11 = vpop.f32.mrb[69].mxu1  ;;  %v2120_v33 = vadd.f32 %v2119_v62, %v3614_v3 }
0x1101   :  { %v2122_v63 = vadd.f32 %v2121_v11, %v3589_v35  ;;  %v2123_v20 = vpop.f32.mrb[70].mxu1 }
0x1102   :  { %v2124_v0 = vpop.f32.mrb[71].mxu1 }
0x1103   :  { %3196 = vtanh.f32 %v2122_v63 }
0x110d   :  { %v3736_v1 = vpop.eup %3196 }
0x110e   :  { %v2127_v16 = vpack.c.bf16 %v3736_v1, %v3736_v1 }
0x1110   :  { %2798 = vmatmul.mubr.msk.bf16.vlgmr.msra.gmra.mrb[52].mxu0 %vm118_vm2, %v2127_v16  ;;  %2957 = vmatmul.mubr.msk.bf16.vlgmr.msra.gmra.mrb[72].mxu1 %vm118_vm2, %v2127_v16 }
0x1111   :  { %2239 = vmatpush1.bf16.msra.mxu0 %v3520_v40  ;;  %2280 = vmatpush1.bf16.msra.mxu1 %v3525_v42 }
0x1112   :  { %2802 = vmatprep.subr.msk.bf16.mxu0 %vm247_vm4, %v3535_v45  ;;  %2804 = vmatprep.subr.msk.bf16.mxu1 %vm247_vm4, %v3537_v46 }
0x1113   :  { %2270 = vmatprep.mubr.bf16.mxu0 %v3241_v2  ;;  %2311 = vmatprep.mubr.bf16.mxu1 %v3241_v2 }
0x1115   :  { %2241 = vmatpush1.bf16.msra.mxu0 %v3549_v52  ;;  %2282 = vmatpush1.bf16.msra.mxu1 %v3552_v53 }
0x1116   :  { %2325 = vmatprep.subr.bf16.mxu0 %v3542_v51  ;;  %2960 = vmatprep.subr.bf16.mxu1 %v3242_v12 }
0x11e3   :  { %v2165_v6 = vpop.f32.mrb[52].mxu0  ;;  %v2206_v7 = vpop.f32.mrb[72].mxu1 }
0x11e4   :  { %v2989_v8 = vadd.f32 %v3358_v29, %v2165_v6  ;;  %v2167_v13 = vpop.f32.mrb[53].mxu0  ;;  %v2958_v22 = vpop.f32.mrb[73].mxu1  ;;  %v2207_v24 = vadd.f32 %v2206_v7, %v3367_v34 }
0x11e5   :  { %v2169_v25 = vpop.f32.mrb[54].mxu0  ;;  %v2209_v14 = vpop.f32.mrb[74].mxu1  ;;  %v2991_v44 = vadd.f32 %v3361_v32, %v2167_v13 }
0x11e6   :  { %v2800_v41 = vmul.f32 -1.442695, %v2989_v8  ;;  %v2170_v17 = vpop.f32.mrb[55].mxu0  ;;  %v2959_v18 = vpop.f32.mrb[75].mxu1 }
0x11e7   :  { %v2801_v28 = vmul.f32 -1.442695, %v2991_v44 }
0x11e8   :  { %3198 = vpow2.f32 %v2800_v41 }
0x11e9   :  { %3200 = vpow2.f32 %v2801_v28 }
0x11f2   :  { %v3199_v43 = vpop.eup %3198 }
0x11f3   :  { %v2220_v19 = vadd.f32 1.0, %v3199_v43  ;;  %v3201_v21 = vpop.eup %3200 }
0x11f4   :  { %v2221_v26 = vadd.f32 1.0, %v3201_v21 }
0x11f5   :  { %3202 = vrcp.f32 %v2220_v19 }
0x11f6   :  { %3204 = vrcp.f32 %v2221_v26 }
0x11ff   :  { %v3203_v23 = vpop.eup %3202 }
0x1200   :  { %v2226_v27 = vmul.f32 %v3203_v23, %v2120_v33  ;;  %v3205_v30 = vpop.eup %3204 }
0x1201   :  { %v2229_v31 = vsub.f32 1.0, %v3205_v30  ;;  %v2231_v36 = vmul.f32 %v3205_v30, %v3195_v60 }
0x1202   :  { %v2227_v5 = vadd.f32 %v2226_v27, %v2207_v24 }
0x1204   :  { %3206 = vtanh.f32 %v2227_v5 }
0x120e   :  { %v3207_v4 = vpop.eup %3206 }
0x120f   :  { %v2230_v54 = vmul.f32 %v3207_v4, %v2229_v31 }
0x1211   :  { %v2232_v37 = vadd.f32 %v2231_v36, %v2230_v54 }
0x1213   :  { %3208 = vtanh.f32 %v2232_v37 }
0x121d   :  { %v3209_v38 = vpop.eup %3208 }
0x121e   :  { %v2234_v9 = vpack.c.bf16 %v3209_v38, %v3209_v38 }
0x1220   :  { %2803 = vmatmul.mubr.msk.bf16.vlgmr.msra.gmra.mrb[56].mxu0 %vm243_vm5, %v2234_v9  ;;  %2805 = vmatmul.mubr.msk.bf16.vlgmr.msra.gmra.mrb[76].mxu1 %vm243_vm5, %v2234_v9 }
0x1221   :  { %2326 = vmatpush1.bf16.msra.mxu0 %v3573_v50  ;;  %2961 = vmatpush3.bf16.msra.mxu1 %v3576_v47 }
0x1222   :  { %2357 = vmatprep.mubr.bf16.mxu0 %v3241_v2  ;;  %2962 = vmatprep.mubr.msk.bf16.mxu1 %vm3243_vm3, %v3242_v12 }
0x1223   :  { %2432 = vmatprep.subr.bf16.mxu0 %v3510_v10  ;;  %2473 = vmatprep.subr.bf16.mxu1 %v3515_v39 }
0x12f3   :  { %v2313_v48 = vpop.f32.mrb[76].mxu1 }
0x12f4   :  { %v2315_v15 = vpop.f32.mrb[77].mxu1  ;;  %v2314_v8 = vadd.f32 %v2313_v48, %v3614_v3 }
0x12f5   :  { %v2316_v49 = vadd.f32 %v2315_v15, %v3589_v35  ;;  %v2317_v55 = vpop.f32.mrb[78].mxu1 }
0x12f6   :  { %v2318_v56 = vpop.f32.mrb[79].mxu1 }
0x12f7   :  { %3210 = vtanh.f32 %v2316_v49 }
0x1301   :  { %v3768_v57 = vpop.eup %3210 }
0x1302   :  { %v2321_v58 = vpack.c.bf16 %v3768_v57, %v3768_v57 }
0x1304   :  { %2806 = vmatmul.mubr.msk.bf16.vlgmr.msra.gmra.mrb[56].mxu0 %vm118_vm2, %v2321_v58  ;;  %2963 = vmatmul.mubr.msk.bf16.vlgmr.msra.gmra.mrb[80].mxu1 %vm118_vm2, %v2321_v58 }
0x1305   :  { %2433 = vmatpush1.bf16.msra.mxu0 %v3520_v40  ;;  %2474 = vmatpush1.bf16.msra.mxu1 %v3525_v42 }
0x1306   :  { %2810 = vmatprep.subr.msk.bf16.mxu0 %vm247_vm4, %v3535_v45  ;;  %2812 = vmatprep.subr.msk.bf16.mxu1 %vm247_vm4, %v3537_v46 }
0x1307   :  { %2464 = vmatprep.mubr.bf16.mxu0 %v3241_v2  ;;  %2505 = vmatprep.mubr.bf16.mxu1 %v3241_v2 }
0x1309   :  { %2435 = vmatpush1.bf16.msra.mxu0 %v3549_v52  ;;  %2476 = vmatpush1.bf16.msra.mxu1 %v3552_v53 }
0x130a   :  { %2519 = vmatprep.subr.bf16.mxu0 %v3542_v51  ;;  %2966 = vmatprep.subr.bf16.mxu1 %v3242_v12 }
0x13d7   :  { %v2359_v10 = vpop.f32.mrb[56].mxu0  ;;  %v2400_v40 = vpop.f32.mrb[80].mxu1 }
0x13d8   :  { %v2993_v59 = vadd.f32 %v3358_v29, %v2359_v10  ;;  %v2361_v45 = vpop.f32.mrb[57].mxu0  ;;  %v2964_v60 = vpop.f32.mrb[81].mxu1  ;;  %v2401_v22 = vadd.f32 %v2400_v40, %v3367_v34 }
0x13d9   :  { %v2363_v61 = vpop.f32.mrb[58].mxu0  ;;  %v2403_v62 = vpop.f32.mrb[82].mxu1  ;;  %v2995_v0 = vadd.f32 %v3361_v32, %v2361_v45 }
0x13da   :  { %v2808_v11 = vmul.f32 -1.442695, %v2993_v59  ;;  %v2364_v63 = vpop.f32.mrb[59].mxu0  ;;  %v2965_v20 = vpop.f32.mrb[83].mxu1 }
0x13db   :  { %v2809_v52 = vmul.f32 -1.442695, %v2995_v0 }
0x13dc   :  { %3212 = vpow2.f32 %v2808_v11 }
0x13dd   :  { %3214 = vpow2.f32 %v2809_v52  ;;  %v2671_v52 = vrot.slane %v3768_v57, 4 }
0x13e6   :  { %v3213_v16 = vpop.eup %3212 }
0x13e7   :  { %v2414_v51 = vadd.f32 1.0, %v3213_v16  ;;  %v3215_v6 = vpop.eup %3214  ;;  %v2674_v16 = vrot.slane %v3736_v1, 2 }
0x13e8   :  { %v2415_v7 = vadd.f32 1.0, %v3215_v6 }
0x13e9   :  { %3216 = vrcp.f32 %v2414_v51 }
0x13ea   :  { %3218 = vrcp.f32 %v2415_v7 }
0x13f3   :  { %v3217_v13 = vpop.eup %3216 }
0x13f4   :  { %v2420_v25 = vmul.f32 %v3217_v13, %v2314_v8  ;;  %v3219_v41 = vpop.eup %3218 }
0x13f5   :  { %v2423_v17 = vsub.f32 1.0, %v3219_v41  ;;  %v2425_v28 = vmul.f32 %v3219_v41, %v3209_v38 }
0x13f6   :  { %v2421_v14 = vadd.f32 %v2420_v25, %v2401_v22 }
0x13f8   :  { %3220 = vtanh.f32 %v2421_v14 }
0x1402   :  { %v3221_v18 = vpop.eup %3220 }
0x1403   :  { %v2424_v44 = vmul.f32 %v3221_v18, %v2423_v17 }
0x1405   :  { %v2426_v43 = vadd.f32 %v2425_v28, %v2424_v44 }
0x1407   :  { %3222 = vtanh.f32 %v2426_v43 }
0x1411   :  { %v3223_v19 = vpop.eup %3222 }
0x1412   :  { %v2428_v21 = vpack.c.bf16 %v3223_v19, %v3223_v19 }
0x1414   :  { %2811 = vmatmul.mubr.msk.bf16.vlgmr.msra.gmra.mrb[60].mxu0 %vm243_vm5, %v2428_v21  ;;  %2813 = vmatmul.mubr.msk.bf16.vlgmr.msra.gmra.mrb[84].mxu1 %vm243_vm5, %v2428_v21 }
0x1415   :  { %2520 = vmatpush1.bf16.msra.mxu0 %v3573_v50  ;;  %2967 = vmatpush3.bf16.msra.mxu1 %v3576_v47 }
0x1416   :  { %2551 = vmatprep.mubr.bf16.mxu0 %v3241_v2  ;;  %2968 = vmatprep.mubr.msk.bf16.mxu1 %vm3243_vm3, %v3242_v12 }
0x1417   :  { %2626 = vmatprep.subr.bf16.mxu0 %v3515_v39 }
0x14e7   :  { %v2507_v26 = vpop.f32.mrb[84].mxu1 }
0x14e8   :  { %v2509_v33 = vpop.f32.mrb[85].mxu1  ;;  %v2508_v15 = vadd.f32 %v2507_v26, %v3614_v3 }
0x14e9   :  { %v2510_v23 = vadd.f32 %v2509_v33, %v3589_v35  ;;  %v2511_v24 = vpop.f32.mrb[86].mxu1 }
0x14ea   :  { %v2512_v27 = vpop.f32.mrb[87].mxu1 }
0x14eb   :  { %3224 = vtanh.f32 %v2510_v23 }
0x14f5   :  { %v3225_v5 = vpop.eup %3224 }
0x14f6   :  { %v2515_v30 = vpack.c.bf16 %v3225_v5, %v3225_v5  ;;  %v2668_v20 = vrot.slane %v3225_v5, 6 }
0x14f8   :  { %2814 = vmatmul.mubr.msk.bf16.vlgmr.msra.gmra.mrb[60].mxu0 %vm118_vm2, %v2515_v30  ;;  %2969 = vmatmul.mubr.msk.bf16.vlgmr.msra.gmra.mrb[88].mxu1 %vm118_vm2, %v2515_v30 }
0x14f9   :  { %2627 = vmatpush1.bf16.msra.mxu0 %v3525_v42  ;;  %2658 = vmatprep.mubr.bf16.mxu0 %v3241_v2 }
0x14fa   :  { %2818 = vmatprep.subr.msk.bf16.mxu0 %vm247_vm4, %v3537_v46 }
0x14fd   :  { %2629 = vmatpush1.bf16.msra.mxu0 %v3552_v53 }
0x15cb   :  { %v2553_v12 = vpop.f32.mrb[60].mxu0  ;;  %v2594_v39 = vpop.f32.mrb[88].mxu1 }
0x15cc   :  { %v2997_v50 = vadd.f32 %v3358_v29, %v2553_v12  ;;  %v2555_v47 = vpop.f32.mrb[61].mxu0  ;;  %v2970_v31 = vpop.f32.mrb[89].mxu1  ;;  %v2595_v49 = vadd.f32 %v2594_v39, %v3367_v34 }
0x15cd   :  { %v2557_v4 = vpop.f32.mrb[62].mxu0  ;;  %v2597_v54 = vpop.f32.mrb[90].mxu1  ;;  %v2999_v42 = vadd.f32 %v3361_v32, %v2555_v47 }
0x15ce   :  { %v2816_v36 = vmul.f32 -1.442695, %v2997_v50  ;;  %v2558_v37 = vpop.f32.mrb[63].mxu0  ;;  %v2971_v38 = vpop.f32.mrb[91].mxu1 }
0x15cf   :  { %v2817_v2 = vmul.f32 -1.442695, %v2999_v42 }
0x15d0   :  { %3226 = vpow2.f32 %v2816_v36 }
0x15d1   :  { %3228 = vpow2.f32 %v2817_v2 }
0x15da   :  { %v3227_v9 = vpop.eup %3226 }
0x15db   :  { %v2608_v46 = vadd.f32 1.0, %v3227_v9  ;;  %v3229_v53 = vpop.eup %3228 }
0x15dc   :  { %v2609_v48 = vadd.f32 1.0, %v3229_v53 }
0x15dd   :  { %3230 = vrcp.f32 %v2608_v46 }
0x15de   :  { %3232 = vrcp.f32 %v2609_v48 }
0x15e7   :  { %v3231_v29 = vpop.eup %3230 }
0x15e8   :  { %v2614_v55 = vmul.f32 %v3231_v29, %v2508_v15  ;;  %v3233_v58 = vpop.eup %3232 }
0x15e9   :  { %v2617_v10 = vsub.f32 1.0, %v3233_v58  ;;  %v2619_v40 = vmul.f32 %v3233_v58, %v3223_v19 }
0x15ea   :  { %v2615_v56 = vadd.f32 %v2614_v55, %v2595_v49 }
0x15ec   :  { %3234 = vtanh.f32 %v2615_v56 }
0x15f6   :  { %v3235_v32 = vpop.eup %3234 }
0x15f7   :  { %v2618_v59 = vmul.f32 %v3235_v32, %v2617_v10 }
0x15f9   :  { %v2620_v45 = vadd.f32 %v2619_v40, %v2618_v59 }
0x15fb   :  { %3236 = vtanh.f32 %v2620_v45 }
0x1605   :  { %v3237_v60 = vpop.eup %3236 }
0x1606   :  { %v2622_v61 = vpack.c.bf16 %v3237_v60, %v3237_v60 }
0x1608   :  { %2819 = vmatmul.mubr.msk.bf16.vlgmr.msra.gmra.mrb[64].mxu0 %vm243_vm5, %v2622_v61 }
0x16db   :  { %v2660_v62 = vpop.f32.mrb[64].mxu0 }
0x16dc   :  { %v2661_v3 = vpop.f32.mrb[65].mxu0 }
0x16dd   :  { %v2662_v11 = vadd.f32 %v2661_v3, %v3589_v35  ;;  %v2663_v34 = vpop.f32.mrb[66].mxu0 }
0x16de   :  { %v2664_v63 = vpop.f32.mrb[67].mxu0 }
0x16df   :  { %3238 = vtanh.f32 %v2662_v11 }
0x16e9   :  { %v3239_v0 = vpop.eup %3238 }
0x16ea   :  { %v2685_v51 = vsel %vm247_vm4, %v3239_v0, %v2668_v20 }
0x16eb   :  { %v2687_v6 = vsel %vm2686_vm6, %v2685_v51, %v2671_v52 }
0x16ec   :  { %v2688_v7 = vsel %vm122_vm0, %v2687_v6, %v2674_v16 }
0x16ed   :  { %2692 = vst.msk [vmem:[%s3824_s3] sm:$0xff] %vm118_vm2, %v2688_v7 }

</bundles_post_ra>
